<compile_context>
chip_gen: v7x
topology: tpu7x:2x2x1
jax: 0.10.0
libtpu: 0.0.40
codegen_flags: <defaults>
</compile_context>

<pallas_src>
import math

import jax
import jax.numpy as jnp
from jax.experimental import pallas as pl
from jax.experimental.pallas import tpu as pltpu


def _round_up(x, m):
    return ((x + m - 1) // m) * m


def _pick_tile_b(B):
    """>=2 batch tiles when B allows (2 TCs on v7x), cap 256, sublane aligned."""
    n_tiles = max(2, pl.cdiv(B, 256))
    tile = pl.cdiv(B, n_tiles)
    return min(256, max(8, _round_up(tile, 8)))


def _pick_tile_k(F):
    """Largest 128-multiple <=512 that divides F; else full F (single K step)."""
    if F <= 512 or F % 128 != 0:
        return F
    for tk in (512, 384, 256, 128):
        if F % tk == 0:
            return tk
    return F


def _vmem_limit_bytes():
    """Per-generation scoped-VMEM limit (96 MiB on 128-MiB parts, 48 MiB on v7x)."""
    try:
        cap = pltpu.get_tpu_info().vmem_capacity_bytes
    except Exception:
        cap = None
    if cap is not None and cap >= 96 * 1024 * 1024:      # v5e / v6e (128 MiB)
        return 96 * 1024 * 1024
    return 48 * 1024 * 1024                              # v7x (64 MiB) / unknown


def _mlp_head_kernel(x_ref, w1_ref, b1_ref, w2_ref, b2_ref, out_ref, h_acc):
    """out = relu(x @ w1 + b1) @ w2 + b2, K-tiled over F with f32 accumulation.

    x arrives in its native dtype and is cast to bf16 in-kernel (no wrapper-side
    cast pass over HBM); both matmuls accumulate in f32 on the MXU; bias + ReLU
    stay f32 on the VPU.
    """
    k = pl.program_id(1)

    @pl.when(k == 0)
    def _():
        h_acc[...] = jnp.zeros_like(h_acc)

    h_acc[...] += jnp.dot(x_ref[...].astype(jnp.bfloat16), w1_ref[...],
                          preferred_element_type=jnp.float32)

    @pl.when(k == pl.num_programs(1) - 1)
    def _():
        h = jnp.maximum(h_acc[...] + b1_ref[...], 0.0)            # f32 bias+ReLU
        logits = jnp.dot(h.astype(jnp.bfloat16), w2_ref[...],
                         preferred_element_type=jnp.float32)
        out_ref[...] = (logits + b2_ref[...]).astype(out_ref.dtype)


def mlp_head_forward(x_flat, w1_bf, b1_f, w2_bf, b2_f, *, tile_b=None, tile_k=None):
    """Batch+K tiled pallas_call.

    x_flat: [B, F] (any float dtype, cast in-kernel), w1_bf: [F, H] bf16,
    b1_f: [1, H] f32, w2_bf: [H, O_pad] bf16 (O_pad % 128 == 0), b2_f: [1, O_pad] f32.
    Returns f32 logits [B, O_pad].
    """
    B, F = x_flat.shape
    H = w1_bf.shape[1]
    O_pad = w2_bf.shape[1]
    assert O_pad % 128 == 0, "head width must be pre-padded to a lane multiple"

    tile_b = _pick_tile_b(B) if tile_b is None else tile_b
    tile_k = _pick_tile_k(F) if tile_k is None else tile_k
    if F % tile_k != 0:            # never allow a ragged K tile (would pollute acc)
        tile_k = F
    num_b = pl.cdiv(B, tile_b)     # ragged last batch tile: reads padded, writes masked
    num_k = F // tile_k
    grid = (num_b, num_k)

    flops = 2 * B * (F * H + H * O_pad)
    bytes_accessed = (x_flat.size * x_flat.dtype.itemsize
                      + w1_bf.size * 2 + w2_bf.size * 2
                      + b1_f.size * 4 + b2_f.size * 4
                      + B * O_pad * 4)

    def run(resident_mode):
        def resident_spec(shape):
            if resident_mode is None:
                return pl.BlockSpec(shape, lambda i, k: (0, 0))
            return pl.BlockSpec(shape, lambda i, k: (0, 0),
                                pipeline_mode=resident_mode)

        in_specs = [
            pl.BlockSpec((tile_b, tile_k), lambda i, k: (i, k)),   # x: streamed
            pl.BlockSpec((tile_k, H), lambda i, k: (k, 0)),        # w1: K-streamed
            resident_spec((1, H)),                                 # b1: resident
            resident_spec((H, O_pad)),                             # w2: resident
            resident_spec((1, O_pad)),                             # b2: resident
        ]
        return pl.pallas_call(
            _mlp_head_kernel,
            out_shape=jax.ShapeDtypeStruct((B, O_pad), jnp.float32),
            grid=grid,
            in_specs=in_specs,
            out_specs=pl.BlockSpec((tile_b, O_pad), lambda i, k: (i, 0)),
            scratch_shapes=[pltpu.VMEM((tile_b, H), jnp.float32)],
            compiler_params=pltpu.CompilerParams(
                dimension_semantics=("parallel", "arbitrary"),
                vmem_limit_bytes=_vmem_limit_bytes()),
            cost_estimate=pl.CostEstimate(
                flops=flops, transcendentals=0, bytes_accessed=bytes_accessed),
        )(x_flat, w1_bf, b1_f, w2_bf, b2_f)

    try:
        # Single-buffer the VMEM-resident weights (they are never re-fetched).
        return run(pl.Buffered(1))
    except Exception:
        # TODO(synk): pipeline_mode=Buffered(1) not supported on this jax build;
        # fall back to default double buffering.
        return run(None)


class ContinualLearnerPallas:
    """JAX/Pallas counterpart of the abstract ContinualLearner module."""

    def __init__(self, in_features, hidden, tasks, classes_per_task,
                 multihead=True, task_nr=0, key=None):
        # CL bookkeeping (mirrors the PyTorch __init__ attributes).
        self.scenario = "task"
        self.tasks = tasks
        self.task_nr = task_nr
        self.classes_per_task = classes_per_task
        self.multihead = multihead

        out_features = tasks * classes_per_task
        key = jax.random.PRNGKey(0) if key is None else key
        k1, k2, k3, k4 = jax.random.split(key, 4)

        # nn.Linear-style init (f32 masters, used for training / reference).
        bound1 = 1.0 / math.sqrt(in_features)
        bound2 = 1.0 / math.sqrt(hidden)
        self.w1 = jax.random.uniform(k1, (in_features, hidden),
                                     jnp.float32, -bound1, bound1)
        self.b1 = jax.random.uniform(k3, (1, hidden),
                                     jnp.float32, -bound1, bound1)
        self.w2 = jax.random.uniform(k2, (hidden, out_features),
                                     jnp.float32, -bound2, bound2)
        self.b2 = jax.random.uniform(k4, (1, out_features),
                                     jnp.float32, -bound2, bound2)

        # Kernel-ready operands prepared ONCE (no per-forward cast/pad/slice).
        self.w1_bf = self.w1.astype(jnp.bfloat16)
        self.b1_f = self.b1.astype(jnp.float32)
        self._head_cache = {}
        self._head(self.task_nr if self.multihead else None)   # warm active head

    def _head(self, task_nr):
        """Per-task (or full) head: lane-padded bf16 w2 + f32 b2, cached."""
        if task_nr not in self._head_cache:
            if task_nr is None:
                w2, b2 = self.w2, self.b2
            else:
                lo = task_nr * self.classes_per_task
                hi = lo + self.classes_per_task
                w2, b2 = self.w2[:, lo:hi], self.b2[:, lo:hi]
            O = w2.shape[1]
            O_pad = _round_up(max(O, 1), 128)
            if O_pad != O:
                w2 = jnp.pad(w2, ((0, 0), (0, O_pad - O)))
                b2 = jnp.pad(b2, ((0, 0), (0, O_pad - O)))
            self._head_cache[task_nr] = (w2.astype(jnp.bfloat16),
                                         b2.astype(jnp.float32), O)
        return self._head_cache[task_nr]

    def set_task(self, task_nr):
        self.task_nr = task_nr

    def forward(self, x):
        # x: NCHW -> [B, C*H*W]; contiguous reshape is free, no dtype cast here
        # (the kernel casts the streamed tile to bf16 on the VPU).
        B = x.shape[0]
        x_flat = x.reshape(B, -1)

        head_key = self.task_nr if self.multihead else None
        w2_bf, b2_f, out_width = self._head(head_key)

        logits = mlp_head_forward(x_flat, self.w1_bf, self.b1_f, w2_bf, b2_f)
        return logits[:, :out_width]


if __name__ == "__main__":
    # Small, module-consistent shapes.
    B, C, Hs, Ws = 2, 4, 16, 16          # x: [2, 4, 16, 16] NCHW -> F = 1024
    hidden = 256                         # multiple of 256: fills v6e/v7x MXU width
    tasks, classes_per_task = 2, 4

    key = jax.random.PRNGKey(0)
    kx, kp = jax.random.split(key)
    x = jax.random.normal(kx, (B, C, Hs, Ws), jnp.float32)

    model = ContinualLearnerPallas(
        in_features=C * Hs * Ws, hidden=hidden,
        tasks=tasks, classes_per_task=classes_per_task,
        multihead=True, task_nr=1, key=kp)

    out = model.forward(x)
    out = jax.block_until_ready(out)

    # Shape / finiteness checks.
    assert out.shape == (B, classes_per_task), out.shape
    assert jnp.all(jnp.isfinite(out))

    # f32 reference check (bf16 operands + f32 accumulation: loose tolerance).
    x_flat = x.reshape(B, -1).astype(jnp.float32)
    h_ref = jnp.maximum(x_flat @ model.w1 + model.b1, 0.0)
    logits_ref = h_ref @ model.w2 + model.b2
    lo = model.task_nr * classes_per_task
    ref = logits_ref[:, lo:lo + classes_per_task]
    assert jnp.allclose(out, ref, atol=5e-2, rtol=5e-2), (
        float(jnp.max(jnp.abs(out - ref))))

    print("KERNEL_OK")
</pallas_src>

<mosaic_0001>
module attributes {stable_mosaic.version = 11 : i64} {
  func.func @_mlp_head_kernel(%arg0: i32, %arg1: i32, %arg2: memref<8x512xf32, #tpu.memory_space<vmem>>, %arg3: memref<512x256xbf16, #tpu.memory_space<vmem>>, %arg4: memref<1x256xf32, #tpu.memory_space<vmem>>, %arg5: memref<256x128xbf16, #tpu.memory_space<vmem>>, %arg6: memref<1x128xf32, #tpu.memory_space<vmem>>, %arg7: memref<8x128xf32, #tpu.memory_space<vmem>>, %arg8: memref<8x256xf32, #tpu.memory_space<vmem>>) attributes {dimension_semantics = [#tpu.dimension_semantics<parallel>, #tpu.dimension_semantics<arbitrary>], iteration_bounds = array<i64: 1, 2>, scalar_prefetch = 0 : i64, scratch_operands = 1 : i64, tpu.core_type = #tpu.core_type<tc>, window_params = [{transform_indices = @transform_0, window_bounds = array<i64: 8, 512>}, {transform_indices = @transform_1, window_bounds = array<i64: 512, 256>}, {pipeline_mode = #tpu.pipeline_mode<synchronous>, transform_indices = @transform_2, window_bounds = array<i64: 1, 256>}, {pipeline_mode = #tpu.pipeline_mode<synchronous>, transform_indices = @transform_3, window_bounds = array<i64: 256, 128>}, {pipeline_mode = #tpu.pipeline_mode<synchronous>, transform_indices = @transform_4, window_bounds = array<i64: 1, 128>}, {transform_indices = @transform_5, window_bounds = array<i64: 8, 128>}]} {
    %c0_i32 = arith.constant 0 : i32
    %0 = arith.cmpi eq, %arg1, %c0_i32 : i32
    %1 = arith.extui %0 : i1 to i32
    %c0_i32_0 = arith.constant 0 : i32
    %2 = arith.cmpi ne, %1, %c0_i32_0 : i32
    scf.if %2 {
      %cst_9 = arith.constant 0.000000e+00 : f32
      %13 = vector.broadcast %cst_9 : f32 to vector<8x256xf32>
      %c0_10 = arith.constant 0 : index
      %c0_11 = arith.constant 0 : index
      %14 = vector.load %arg8[%c0_10, %c0_11] : memref<8x256xf32, #tpu.memory_space<vmem>>, vector<8x256xf32>
      tpu.vector_store %arg8[%c0_10, %c0_11], %13 {strides = array<i32>} : memref<8x256xf32, #tpu.memory_space<vmem>>, vector<8x256xf32>,
    } else {
    }
    %c0 = arith.constant 0 : index
    %c0_1 = arith.constant 0 : index
    %3 = vector.load %arg8[%c0, %c0_1] : memref<8x256xf32, #tpu.memory_space<vmem>>, vector<8x256xf32>
    %c0_2 = arith.constant 0 : index
    %c0_3 = arith.constant 0 : index
    %4 = vector.load %arg2[%c0_2, %c0_3] : memref<8x512xf32, #tpu.memory_space<vmem>>, vector<8x512xf32>
    %5 = arith.truncf %4 : vector<8x512xf32> to vector<8x512xbf16>
    %c0_4 = arith.constant 0 : index
    %c0_5 = arith.constant 0 : index
    %6 = vector.load %arg3[%c0_4, %c0_5] : memref<512x256xbf16, #tpu.memory_space<vmem>>, vector<512x256xbf16>
    %cst = arith.constant dense<0.000000e+00> : vector<8x256xf32>
    %7 = tpu.matmul %5, %6, %cst {dimension_numbers = #tpu.dot_dimension_numbers<[1], [0], [0], [1], [0, 0, 1, 1], [], []>} : vector<8x512xbf16>, vector<512x256xbf16>, vector<8x256xf32> -> vector<8x256xf32>
    %8 = arith.addf %3, %7 : vector<8x256xf32>
    %c0_6 = arith.constant 0 : index
    %c0_7 = arith.constant 0 : index
    %9 = vector.load %arg8[%c0_6, %c0_7] : memref<8x256xf32, #tpu.memory_space<vmem>>, vector<8x256xf32>
    tpu.vector_store %arg8[%c0_6, %c0_7], %8 {strides = array<i32>} : memref<8x256xf32, #tpu.memory_space<vmem>>, vector<8x256xf32>,
    %c1_i32 = arith.constant 1 : i32
    %10 = arith.cmpi eq, %arg1, %c1_i32 : i32
    %11 = arith.extui %10 : i1 to i32
    %c0_i32_8 = arith.constant 0 : i32
    %12 = arith.cmpi ne, %11, %c0_i32_8 : i32
    scf.if %12 {
      %c0_9 = arith.constant 0 : index
      %c0_10 = arith.constant 0 : index
      %13 = vector.load %arg8[%c0_9, %c0_10] : memref<8x256xf32, #tpu.memory_space<vmem>>, vector<8x256xf32>
      %c0_11 = arith.constant 0 : index
      %c0_12 = arith.constant 0 : index
      %14 = vector.load %arg4[%c0_11, %c0_12] : memref<1x256xf32, #tpu.memory_space<vmem>>, vector<1x256xf32>
      %15 = vector.broadcast %14 : vector<1x256xf32> to vector<8x256xf32>
      %16 = arith.addf %13, %15 : vector<8x256xf32>
      %cst_13 = arith.constant 0.000000e+00 : f32
      %17 = vector.broadcast %cst_13 : f32 to vector<8x256xf32>
      %18 = arith.maximumf %16, %17 : vector<8x256xf32>
      %19 = arith.truncf %18 : vector<8x256xf32> to vector<8x256xbf16>
      %c0_14 = arith.constant 0 : index
      %c0_15 = arith.constant 0 : index
      %20 = vector.load %arg5[%c0_14, %c0_15] : memref<256x128xbf16, #tpu.memory_space<vmem>>, vector<256x128xbf16>
      %cst_16 = arith.constant dense<0.000000e+00> : vector<8x128xf32>
      %21 = tpu.matmul %19, %20, %cst_16 {dimension_numbers = #tpu.dot_dimension_numbers<[1], [0], [0], [1], [0, 0, 1, 1], [], []>} : vector<8x256xbf16>, vector<256x128xbf16>, vector<8x128xf32> -> vector<8x128xf32>
      %c0_17 = arith.constant 0 : index
      %c0_18 = arith.constant 0 : index
      %22 = vector.load %arg6[%c0_17, %c0_18] : memref<1x128xf32, #tpu.memory_space<vmem>>, vector<1x128xf32>
      %23 = vector.broadcast %22 : vector<1x128xf32> to vector<8x128xf32>
      %24 = arith.addf %21, %23 : vector<8x128xf32>
      %c0_19 = arith.constant 0 : index
      %c0_20 = arith.constant 0 : index
      %25 = vector.load %arg7[%c0_19, %c0_20] : memref<8x128xf32, #tpu.memory_space<vmem>>, vector<8x128xf32>
      tpu.vector_store %arg7[%c0_19, %c0_20], %24 {strides = array<i32>} : memref<8x128xf32, #tpu.memory_space<vmem>>, vector<8x128xf32>,
    } else {
    }
    return
  }
  func.func @transform_0(%arg0: i32, %arg1: i32) -> (i32, i32) {
    %c0_i32 = arith.constant 0 : i32
    return %arg0, %arg1 : i32, i32
  }
  func.func @transform_1(%arg0: i32, %arg1: i32) -> (i32, i32) {
    %c0_i32 = arith.constant 0 : i32
    %c0_i32_0 = arith.constant 0 : i32
    return %arg1, %c0_i32 : i32, i32
  }
  func.func @transform_2(%arg0: i32, %arg1: i32) -> (i32, i32) {
    %c0_i32 = arith.constant 0 : i32
    %c0_i32_0 = arith.constant 0 : i32
    %c0_i32_1 = arith.constant 0 : i32
    return %c0_i32, %c0_i32_0 : i32, i32
  }
  func.func @transform_3(%arg0: i32, %arg1: i32) -> (i32, i32) {
    %c0_i32 = arith.constant 0 : i32
    %c0_i32_0 = arith.constant 0 : i32
    %c0_i32_1 = arith.constant 0 : i32
    return %c0_i32, %c0_i32_0 : i32, i32
  }
  func.func @transform_4(%arg0: i32, %arg1: i32) -> (i32, i32) {
    %c0_i32 = arith.constant 0 : i32
    %c0_i32_0 = arith.constant 0 : i32
    %c0_i32_1 = arith.constant 0 : i32
    return %c0_i32, %c0_i32_0 : i32, i32
  }
  func.func @transform_5(%arg0: i32, %arg1: i32) -> (i32, i32) {
    %c0_i32 = arith.constant 0 : i32
    %c0_i32_0 = arith.constant 0 : i32
    return %arg0, %c0_i32 : i32, i32
  }
}

module attributes {stable_mosaic.version = 11 : i64} {
  func.func @_mlp_head_kernel(%arg0: i32, %arg1: i32, %arg2: memref<8x512xf32, #tpu.memory_space<vmem>>, %arg3: memref<512x256xbf16, #tpu.memory_space<vmem>>, %arg4: memref<1x256xf32, #tpu.memory_space<vmem>>, %arg5: memref<256x128xbf16, #tpu.memory_space<vmem>>, %arg6: memref<1x128xf32, #tpu.memory_space<vmem>>, %arg7: memref<8x128xf32, #tpu.memory_space<vmem>>, %arg8: memref<8x256xf32, #tpu.memory_space<vmem>>) attributes {dimension_semantics = [#tpu.dimension_semantics<parallel>, #tpu.dimension_semantics<arbitrary>], iteration_bounds = array<i64: 1, 2>, scalar_prefetch = 0 : i64, scratch_operands = 1 : i64, tpu.core_type = #tpu.core_type<tc>, window_params = [{transform_indices = @transform_0, window_bounds = array<i64: 8, 512>}, {transform_indices = @transform_1, window_bounds = array<i64: 512, 256>}, {pipeline_mode = #tpu.pipeline_mode<synchronous>, transform_indices = @transform_2, window_bounds = array<i64: 1, 256>}, {pipeline_mode = #tpu.pipeline_mode<synchronous>, transform_indices = @transform_3, window_bounds = array<i64: 256, 128>}, {pipeline_mode = #tpu.pipeline_mode<synchronous>, transform_indices = @transform_4, window_bounds = array<i64: 1, 128>}, {transform_indices = @transform_5, window_bounds = array<i64: 8, 128>}]} {
    %c0_i32 = arith.constant 0 : i32
    %0 = arith.cmpi eq, %arg1, %c0_i32 : i32
    %1 = arith.extui %0 : i1 to i32
    %c0_i32_0 = arith.constant 0 : i32
    %2 = arith.cmpi ne, %1, %c0_i32_0 : i32
    scf.if %2 {
      %cst_9 = arith.constant 0.000000e+00 : f32
      %13 = vector.broadcast %cst_9 : f32 to vector<8x256xf32>
      %c0_10 = arith.constant 0 : index
      %c0_11 = arith.constant 0 : index
      %14 = vector.load %arg8[%c0_10, %c0_11] : memref<8x256xf32, #tpu.memory_space<vmem>>, vector<8x256xf32>
      tpu.vector_store %arg8[%c0_10, %c0_11], %13 {strides = array<i32>} : memref<8x256xf32, #tpu.memory_space<vmem>>, vector<8x256xf32>,
    } else {
    }
    %c0 = arith.constant 0 : index
    %c0_1 = arith.constant 0 : index
    %3 = vector.load %arg8[%c0, %c0_1] : memref<8x256xf32, #tpu.memory_space<vmem>>, vector<8x256xf32>
    %c0_2 = arith.constant 0 : index
    %c0_3 = arith.constant 0 : index
    %4 = vector.load %arg2[%c0_2, %c0_3] : memref<8x512xf32, #tpu.memory_space<vmem>>, vector<8x512xf32>
    %5 = arith.truncf %4 : vector<8x512xf32> to vector<8x512xbf16>
    %c0_4 = arith.constant 0 : index
    %c0_5 = arith.constant 0 : index
    %6 = vector.load %arg3[%c0_4, %c0_5] : memref<512x256xbf16, #tpu.memory_space<vmem>>, vector<512x256xbf16>
    %cst = arith.constant dense<0.000000e+00> : vector<8x256xf32>
    %7 = tpu.matmul %5, %6, %cst {dimension_numbers = #tpu.dot_dimension_numbers<[1], [0], [0], [1], [0, 0, 1, 1], [], []>} : vector<8x512xbf16>, vector<512x256xbf16>, vector<8x256xf32> -> vector<8x256xf32>
    %8 = arith.addf %3, %7 : vector<8x256xf32>
    %c0_6 = arith.constant 0 : index
    %c0_7 = arith.constant 0 : index
    %9 = vector.load %arg8[%c0_6, %c0_7] : memref<8x256xf32, #tpu.memory_space<vmem>>, vector<8x256xf32>
    tpu.vector_store %arg8[%c0_6, %c0_7], %8 {strides = array<i32>} : memref<8x256xf32, #tpu.memory_space<vmem>>, vector<8x256xf32>,
    %c1_i32 = arith.constant 1 : i32
    %10 = arith.cmpi eq, %arg1, %c1_i32 : i32
    %11 = arith.extui %10 : i1 to i32
    %c0_i32_8 = arith.constant 0 : i32
    %12 = arith.cmpi ne, %11, %c0_i32_8 : i32
    scf.if %12 {
      %c0_9 = arith.constant 0 : index
      %c0_10 = arith.constant 0 : index
      %13 = vector.load %arg8[%c0_9, %c0_10] : memref<8x256xf32, #tpu.memory_space<vmem>>, vector<8x256xf32>
      %c0_11 = arith.constant 0 : index
      %c0_12 = arith.constant 0 : index
      %14 = vector.load %arg4[%c0_11, %c0_12] : memref<1x256xf32, #tpu.memory_space<vmem>>, vector<1x256xf32>
      %15 = vector.broadcast %14 : vector<1x256xf32> to vector<8x256xf32>
      %16 = arith.addf %13, %15 : vector<8x256xf32>
      %cst_13 = arith.constant 0.000000e+00 : f32
      %17 = vector.broadcast %cst_13 : f32 to vector<8x256xf32>
      %18 = arith.maximumf %16, %17 : vector<8x256xf32>
      %19 = arith.truncf %18 : vector<8x256xf32> to vector<8x256xbf16>
      %c0_14 = arith.constant 0 : index
      %c0_15 = arith.constant 0 : index
      %20 = vector.load %arg5[%c0_14, %c0_15] : memref<256x128xbf16, #tpu.memory_space<vmem>>, vector<256x128xbf16>
      %cst_16 = arith.constant dense<0.000000e+00> : vector<8x128xf32>
      %21 = tpu.matmul %19, %20, %cst_16 {dimension_numbers = #tpu.dot_dimension_numbers<[1], [0], [0], [1], [0, 0, 1, 1], [], []>} : vector<8x256xbf16>, vector<256x128xbf16>, vector<8x128xf32> -> vector<8x128xf32>
      %c0_17 = arith.constant 0 : index
      %c0_18 = arith.constant 0 : index
      %22 = vector.load %arg6[%c0_17, %c0_18] : memref<1x128xf32, #tpu.memory_space<vmem>>, vector<1x128xf32>
      %23 = vector.broadcast %22 : vector<1x128xf32> to vector<8x128xf32>
      %24 = arith.addf %21, %23 : vector<8x128xf32>
      %c0_19 = arith.constant 0 : index
      %c0_20 = arith.constant 0 : index
      %25 = vector.load %arg7[%c0_19, %c0_20] : memref<8x128xf32, #tpu.memory_space<vmem>>, vector<8x128xf32>
      tpu.vector_store %arg7[%c0_19, %c0_20], %24 {strides = array<i32>} : memref<8x128xf32, #tpu.memory_space<vmem>>, vector<8x128xf32>,
    } else {
    }
    return
  }
  func.func @transform_0(%arg0: i32, %arg1: i32) -> (i32, i32) {
    %c0_i32 = arith.constant 0 : i32
    return %arg0, %arg1 : i32, i32
  }
  func.func @transform_1(%arg0: i32, %arg1: i32) -> (i32, i32) {
    %c0_i32 = arith.constant 0 : i32
    %c0_i32_0 = arith.constant 0 : i32
    return %arg1, %c0_i32 : i32, i32
  }
  func.func @transform_2(%arg0: i32, %arg1: i32) -> (i32, i32) {
    %c0_i32 = arith.constant 0 : i32
    %c0_i32_0 = arith.constant 0 : i32
    %c0_i32_1 = arith.constant 0 : i32
    return %c0_i32, %c0_i32_0 : i32, i32
  }
  func.func @transform_3(%arg0: i32, %arg1: i32) -> (i32, i32) {
    %c0_i32 = arith.constant 0 : i32
    %c0_i32_0 = arith.constant 0 : i32
    %c0_i32_1 = arith.constant 0 : i32
    return %c0_i32, %c0_i32_0 : i32, i32
  }
  func.func @transform_4(%arg0: i32, %arg1: i32) -> (i32, i32) {
    %c0_i32 = arith.constant 0 : i32
    %c0_i32_0 = arith.constant 0 : i32
    %c0_i32_1 = arith.constant 0 : i32
    return %c0_i32, %c0_i32_0 : i32, i32
  }
  func.func @transform_5(%arg0: i32, %arg1: i32) -> (i32, i32) {
    %c0_i32 = arith.constant 0 : i32
    %c0_i32_0 = arith.constant 0 : i32
    return %arg0, %c0_i32 : i32, i32
  }
}

</mosaic_0001>

<bundles_post_ra>
// kernel: tpu_custom_call.1
= control target key start
LH: loop header
LB: loop body
LE: loop exit
PB: predicated region body
PF: predicated region fallthrough
CT: control target
= control target key end

     0   :  { %10 = vsyncpa [#allocation4], 0  ;;  %s1981_s0 = inlined_call_operand.hbm [shape: f32[2,1024], index: 0, kind: input, shape index: {}]   ;;  %s1982_s1 = inlined_call_operand.hbm [shape: bf16[1024,256], index: 1, kind: input, shape index: {}]   ;;  %s1983_s2 = inlined_call_operand.vmem [shape: f32[1,256], index: 2, kind: input, shape index: {}]   ;;  %s1984_s3 = inlined_call_operand.hbm [shape: bf16[256,128], index: 3, kind: input, shape index: {}]   ;;  %s1985_s4 = inlined_call_operand.vmem [shape: f32[1,128], index: 4, kind: input, shape index: {}]   ;;  %s1986_s5 = inlined_call_operand.hbm [shape: f32[2,128], index: 5, kind: output, shape index: {}]  }
   0x1   :  { %12 = vsyncpa [#allocation4 + $0x1], 0 }
   0x2   :  { %13 = vsyncpa [#allocation7], 0 }
   0x3   :  { %15 = vsyncpa [#allocation7 + $0x1], 0 }
   0x4   :  { %16 = vsyncpa [#allocation5], 0  ;;  %s1698_s18 = smov 0   ;;  %s1700_s19 = smov 0  }
   0x5   :  { %s1702_s20 = smov 0   ;;  %s1704_s21 = smov 0  }
   0x6   :  { %s1706_s22 = smov 0   ;;  %s1708_s23 = smov 0  }
   0x7 LB: > { %s1727_s24 = sadd.s32 4294967295, %s1651_s23   ;;  %s31_s25 = sadd.s32 1, %s1647_s22  ;;  %s1651_s23 = sphi %s1708_s23, %s22_s23   ;;  %s1647_s22 = sphi %s1706_s22, %s2005_s22   ;;  %s1643_s21 = sphi %s1704_s21, %s2004_s21   ;;  %s1639_s20 = sphi %s1702_s20, %s2003_s20   ;;  %s1635_s19 = sphi %s1700_s19, %s2002_s19   ;;  %s1631_s18 = sphi %s1698_s18, %s2001_s18  }
   0x8   : > { %p32_p0 = scmp.ge.s32.totalorder %s31_s25, 2  ;;  %s43_s26 = sadd.s32 1, %s1639_s20 }
   0x9   : > { %p50_p1 = scmp.ne.s32.totalorder %s1639_s20, %s1635_s19  ;;  %p51_p2 = scmp.eq.s32.totalorder %s1651_s23, 0 }
   0xa   : > { %s2007_s25 = smov (%p32_p0, %s31_s25), 0  ;;  %p56_p4 = scmp.ne.s32.totalorder %s1635_s19, %s1631_s18 }
   0xb   : > { %p1736_p3 = por %p51_p2, %p50_p1  ;;  %s39_s28 = ssub.s32 %s1647_s22, %s2007_s25 }
   0xc   : > { %p1987_p5 = scmp.eq.s32.totalorder %s1727_s24, 0  ;;  %p41_p6 = scmp.eq.s32.totalorder %s39_s28, 0 }
   0xd   : > { %s1991_s27 = scalar_select %p1736_p3, 1, 0 }
   0xe   : > { %p1166_p7 = scmp.ge.s32.totalorder %s1651_s23, 1  ;;  %p1747_p8 = por %p1987_p5, %p56_p4 }
   0xf   : > { %p182_p9 = scmp.lt.s32.totalorder %s1651_s23, 3  ;;  %s1653_s7 = smov [#allocation8]  }
  0x10   : > { %s1992_s29 = scalar_select %p1747_p8, 1, 0 }
  0x11   : > { %s1753_s30 = scalar_select %p41_p6, %s1639_s20, %s43_s26  }
  0x12   : > { %p1755_p10 = pnand %p1166_p7, %p182_p9  ;;  %s197_s8 = sshll.u32 %s1653_s7, 4  ;;  %s198_s8 = int_to_ptr.vmem [resolvable:$true] %s197_s8 }
  0x13   : > { %s1487_s12 = scalar_lea.hbm %s1984_s3, 2048 }
  0x14   : > { %s1993_s6 = scalar_select %p1755_p10, 1, 0 }
  0x15   : > { %p1301_p11 = pneg %p1755_p10  ;;  %p1488_p13 = scmp.ne.s32.totalorder %s1984_s3, %s1487_s12 }
  0x16   : > { %p1494_p4 = scmp.lt.u32.totalorder %s1487_s12, %s1984_s3 }
  0x17   : > { %p1763_p12 = pnand %p1301_p11, %p1987_p5 }
  0x19   : > { %p1489_p0 = pneg %p1763_p12 }
  0x1b   : > { %p1490_p1 = pnand %p1489_p0, %p1488_p13 }
  0x1d   : > { %p1491_p2 = pneg %p1490_p1 }
  0x1f   : > { %p1496_p6 = pnand %p1494_p4, %p1491_p2 }
  0x21   : > { %1499 = shalt.err (!%p1496_p6)
}
  0x22   : > { %s1500_s17 = scalar_lea.vmem %s198_s8, 2048  ;;  %p1508_p5 = scmp.lt.s32.totalorder %s198_s8, %s198_s8 }
  0x23   : > { %p1501_p7 = scmp.ne.s32.totalorder %s198_s8, %s1500_s17  ;;  %p1509_p8 = scmp.lt.s32.totalorder %s1500_s17, %s1500_s17 }
  0x25   : > { %p1503_p9 = pnand %p1501_p7, %p1489_p0  ;;  %p1510_p10 = por %p1509_p8, %p1508_p5 }
  0x27   : > { %p1504_p11 = pneg %p1503_p9 }
  0x29   : > { %p1511_p3 = pnand %p1510_p10, %p1504_p11 }
  0x2b   : > { %1514 = shalt.err (!%p1511_p3)
}
  0x2c   : > { %s1654_s18 = smov 64   ;;  %s1655_s26 = smov 4  }
  0x2d   : > { %1304 = dma.hbm_to_vmem [thread:$0]  (!%p1763_p12), %s1984_s3, 2048, %s198_s8, [#allocation7], %s1654_s18, %s1654_s18, %s1655_s26  }
  0x2e   : > { %p1168_p13 = scmp.ge.s32.totalorder %s1651_s23, 2 }
  0x2f   : > { %p1995_p1 = scmp.ne.s32.totalorder (!%p1168_p13), %s1991_s27, 0 }
  0x30   : > { %210 = sbr.rel (%p1168_p13) target bundleno = 114 (0x72), region = 28 }
  0x37   : > { %213 = sbr.rel (!%p1995_p1) target bundleno = 87 (0x57), region = 32  ;;  %s214_s10 = sand.u32 (%p1995_p1), 1, %s1639_s20  }
  0x38   : > { %s1169_s11 = sshll.u32 (%p1995_p1), %s214_s10, 5  ;;  %s1787_s12 = scalar_lea.sflag (%p1995_p1), [#allocation4], %s214_s10 }
  0x39   : > { %s218_s13 = scalar_lea.vmem (%p1995_p1), [#allocation3], %s1169_s11 }
  0x3e   : > { %226 = vsyncadd %s1787_s12, 384  ;;  %s1267_s9 = sshll.u32 %s1647_s22, 7  ;;  %s233_s14 = sshll.u32 %s218_s13, 4  ;;  %s1796_s14 = int_to_ptr.vmem [resolvable:$true] %s233_s14 }
  0x3f   : > { %s1794_s8 = scalar_lea.hbm %s1981_s0, %s1267_s9  ;;  %s1517_s28 = scalar_lea.hbm %s1981_s0, 256 }
  0x40   : > { %s1515_s17 = scalar_lea.hbm %s1794_s8, 128  ;;  %p1518_p5 = scmp.lt.u32.totalorder %s1794_s8, %s1981_s0 }
  0x41   : > { %p1516_p3 = scmp.ne.s32.totalorder %s1794_s8, %s1515_s17  ;;  %p1519_p8 = scmp.lt.u32.totalorder %s1517_s28, %s1515_s17 }
  0x42   : > { %p1521_p12 = scmp.lt.u32.totalorder %s1515_s17, %s1794_s8 }
  0x43   : > { %p1520_p10 = por %p1519_p8, %p1518_p5 }
  0x45   : > { %p1522_p0 = por %p1521_p12, %p1520_p10 }
  0x47   : > { %p1523_p2 = pnand %p1522_p0, %p1516_p3 }
  0x49   : > { %1526 = shalt.err (!%p1523_p2)
}
  0x4a   : > { %s1527_s11 = scalar_lea.vmem %s1796_s14, 128  ;;  %s1656_s13 = smov [#allocation3]  }
  0x4b   : > { %p1528_p4 = scmp.ne.s32.totalorder %s1796_s14, %s1527_s11  ;;  %s1529_s9 = sshll.u32 %s1656_s13, 4  ;;  %s1530_s9 = int_to_ptr.vmem [resolvable:$false] %s1529_s9 }
  0x4c   : > { %s1531_s15 = scalar_lea.vmem %s1530_s9, 1024  ;;  %p1532_p6 = scmp.lt.s32.totalorder %s1796_s14, %s1530_s9 }
  0x4d   : > { %p1533_p7 = scmp.lt.s32.totalorder %s1531_s15, %s1527_s11 }
  0x4f   : > { %p1534_p9 = por %p1533_p7, %p1532_p6 }
  0x51   : > { %p1535_p11 = pnand %p1534_p9, %p1528_p4 }
  0x53   : > { %1538 = shalt.err (!%p1535_p11)
}
  0x54   : > { %s1657_s16 = smov 256   ;;  %s1658_s17 = smov 128  }
  0x55   : > { %s1659_s18 = smov 8  }
  0x56   : > { %239 = dma.hbm_to_vmem [thread:$0]  %s1794_s8, 128, %s1796_s14, %s1787_s12, %s1657_s16, %s1658_s17, %s1659_s18  }
  0x57 PF: > { %s243_s26 = sand.u32 1, %s1651_s23   ;;  %s245_s28 = sand.u32 1, %s1639_s20  }
  0x58   : > { %s1172_s7 = sshll.u32 %s245_s28, 9  ;;  %s1269_s10 = sshll.u32 %s1647_s22, 13 }
  0x59   : > { %s1820_s9 = scalar_lea.hbm %s1982_s1, %s1269_s10  ;;  %s247_s15 = scalar_lea.vmem [#allocation6], %s1172_s7 }
  0x5a   : > { %s255_s12 = sshll.u32 %s247_s15, 4  ;;  %s1824_s14 = scalar_lea.sflag [#allocation7], %s243_s26  ;;  %s1822_s12 = int_to_ptr.vmem [resolvable:$true] %s255_s12 }
  0x5b   : > { %s1539_s8 = scalar_lea.hbm %s1820_s9, 8192  ;;  %p1996_p1 = scmp.ne.s32.totalorder %s1991_s27, 0 }
  0x5c   : > { %p1540_p13 = scmp.ne.s32.totalorder %s1820_s9, %s1539_s8  ;;  %s1543_s18 = scalar_lea.hbm %s1982_s1, 16384 }
  0x5d   : > { %p1544_p8 = scmp.lt.u32.totalorder %s1820_s9, %s1982_s1  ;;  %p1545_p10 = scmp.lt.u32.totalorder %s1543_s18, %s1539_s8 }
  0x5e   : > { %p1541_p3 = pnand %p1540_p13, %p1996_p1  ;;  %p1547_p0 = scmp.lt.u32.totalorder %s1539_s8, %s1820_s9 }
  0x5f   : > { %p1546_p12 = por %p1545_p10, %p1544_p8 }
  0x60   : > { %p1542_p5 = pneg %p1541_p3 }
  0x61   : > { %p1548_p2 = por %p1547_p0, %p1546_p12 }
  0x63   : > { %p1549_p4 = pnand %p1548_p2, %p1542_p5 }
  0x65   : > { %1552 = shalt.err (!%p1549_p4)
}
  0x66   : > { %s1553_s26 = scalar_lea.vmem %s1822_s12, 8192  ;;  %s1660_s7 = smov [#allocation6]  }
  0x67   : > { %p1554_p6 = scmp.ne.s32.totalorder %s1822_s12, %s1553_s26  ;;  %s1557_s11 = sshll.u32 %s1660_s7, 4  ;;  %s1558_s11 = int_to_ptr.vmem [resolvable:$false] %s1557_s11 }
  0x68   : > { %s1559_s13 = scalar_lea.vmem %s1558_s11, 16384  ;;  %p1560_p11 = scmp.lt.s32.totalorder %s1822_s12, %s1558_s11 }
  0x69   : > { %p1555_p7 = pnand %p1554_p6, %p1996_p1  ;;  %p1561_p13 = scmp.lt.s32.totalorder %s1559_s13, %s1553_s26 }
  0x6b   : > { %p1556_p9 = pneg %p1555_p7  ;;  %p1562_p3 = por %p1561_p13, %p1560_p11 }
  0x6d   : > { %p1563_p8 = pnand %p1562_p3, %p1556_p9 }
  0x6f   : > { %1566 = shalt.err (!%p1563_p8)
}
  0x70   : > { %s1661_s15 = smov 128   ;;  %s1662_s8 = smov 8  }
  0x71   : > { %1294 = dma.hbm_to_vmem [thread:$0]  (%p1996_p1), %s1820_s9, 8192, %s1822_s12, %s1824_s14, %s1661_s15, %s1661_s15, %s1662_s8  }
  0x72 PF: > { %p1997_p5 = scmp.ne.s32.totalorder %s1993_s6, 0 }
  0x73   : > { %s269_s16 = sand.u32 (!%p1997_p5), 1, %s1635_s19   ;;  %p1998_p10 = scmp.ne.s32.totalorder (!%p1997_p5), %s1992_s29, 0 }
  0x74   : > { %267 = sbr.rel (%p1997_p5) target bundleno = 687 (0x2af), region = 40  ;;  %s1177_s17 = sshll.u32 (!%p1997_p5), %s269_s16, 5 }
  0x75   : > { %s270_s18 = scalar_lea.sflag (!%p1997_p5), [#allocation4], %s269_s16  ;;  %s1851_s28 = scalar_lea.vmem (!%p1997_p5), [#allocation3], %s1177_s17 }
  0x7b   : > { %1614 = dma.done.wait (%p1998_p10), %s270_s18, 512  }
  0x7c   : > { %1616 = vsyncadd (%p1998_p10), %s270_s18, 4294966784  ;;  %s278_s27 = sand.u32 1, %s1727_s24   ;;  %s1178_s9 = sshll.u32 %s269_s16, 9 }
  0x7d   : > { %s279_s12 = scalar_lea.sflag [#allocation7], %s278_s27  ;;  %s1858_s14 = scalar_lea.vmem [#allocation6], %s1178_s9 }
  0x7e   : > { %1618 = dma.done.wait (%p1998_p10), %s279_s12, 8192  }
  0x7f   : > { %1620 = vsyncadd (%p1998_p10), %s279_s12, 4294959104  ;;  %p1999_p1 = scmp.eq.s32.totalorder %s1727_s24, 0 }
  0x81   : > { %1622 = dma.done.wait (%p1999_p1), [#allocation7], 2048   ;;  %p2000_p12 = pmov %p1999_p1 }
  0x82   : > { %p1180_p0 = scmp.ne.s32.totalorder %s1643_s21, 0 }
  0x83   : > { %1624 = vsyncadd (%p2000_p12), [#allocation7], 4294965248  ;;  %v1663_v0 = vmov (!%p1180_p0), 0.0  }
  0x84   : > { %326 = sbr.rel (%p1180_p0) target bundleno = 139 (0x8b), region = 56  ;;  %327 = vst [vmem:[#allocation2] sm:$0xff] (!%p1180_p0), %v1663_v0  ;;  %328 = vst [vmem:[#allocation2 + $0x8] sm:$0xff] (!%p1180_p0), %v1663_v0 }
  0x8b PF: > { %v1369_v1 = vld [vmem:[%s1858_s14 + $0x4] ss:$8 sps:$4 sm:$0xff]   ;;  %v1373_v3 = vld [vmem:[%s1858_s14] ss:$8 sps:$4 sm:$0xff]   ;;  %v1375_v5 = vld [vmem:[%s1858_s14 + $0x14] ss:$8 sps:$4 sm:$0xff]   ;;  %v346_v41 = vlaneseq }
  0x8c   : > { %v1371_v2 = vld [vmem:[%s1858_s14 + $0x104] ss:$8 sps:$4 sm:$0xff]   ;;  %767 = vmatprep.subr.bf16.mxu0 %v1369_v1  ;;  %v1374_v4 = vld [vmem:[%s1858_s14 + $0x100] ss:$8 sps:$4 sm:$0xff]   ;;  %v1377_v6 = vld [vmem:[%s1858_s14 + $0x114] ss:$8 sps:$4 sm:$0xff]  }
  0x8d   : > { %808 = vmatprep.subr.bf16.mxu1 %v1371_v2  ;;  %768 = vmatpush1.bf16.msra.mxu0 %v1373_v3  ;;  %v1379_v7 = vld [vmem:[%s1858_s14 + $0x10] ss:$8 sps:$4 sm:$0xff]   ;;  %v1381_v9 = vld [vmem:[%s1858_s14 + $0x24] ss:$8 sps:$4 sm:$0xff]   ;;  %v1385_v11 = vld [vmem:[%s1858_s14 + $0x20] ss:$8 sps:$4 sm:$0xff]  }
  0x8e   : > { %809 = vmatpush1.bf16.msra.mxu1 %v1374_v4  ;;  %769 = vmatprep.subr.bf16.mxu0 %v1375_v5  ;;  %v1380_v8 = vld [vmem:[%s1858_s14 + $0x110] ss:$8 sps:$4 sm:$0xff]   ;;  %v1383_v10 = vld [vmem:[%s1858_s14 + $0x124] ss:$8 sps:$4 sm:$0xff]   ;;  %v1386_v12 = vld [vmem:[%s1858_s14 + $0x120] ss:$8 sps:$4 sm:$0xff]  }
  0x8f   : > { %810 = vmatprep.subr.bf16.mxu1 %v1377_v6  ;;  %v1387_v13 = vld [vmem:[%s1858_s14 + $0x34] ss:$8 sps:$4 sm:$0xff]   ;;  %v1391_v15 = vld [vmem:[%s1858_s14 + $0x30] ss:$8 sps:$4 sm:$0xff]   ;;  %v1393_v17 = vld [vmem:[%s1858_s14 + $0x44] ss:$8 sps:$4 sm:$0xff]  }
  0x90   : > { %v1389_v14 = vld [vmem:[%s1858_s14 + $0x134] ss:$8 sps:$4 sm:$0xff]   ;;  %v1392_v16 = vld [vmem:[%s1858_s14 + $0x130] ss:$8 sps:$4 sm:$0xff]   ;;  %v1395_v18 = vld [vmem:[%s1858_s14 + $0x144] ss:$8 sps:$4 sm:$0xff]  }
  0x91   : > { %770 = vmatpush1.bf16.msra.mxu0 %v1379_v7  ;;  %v1397_v19 = vld [vmem:[%s1858_s14 + $0x40] ss:$8 sps:$4 sm:$0xff]   ;;  %v1399_v21 = vld [vmem:[%s1858_s14 + $0x54] ss:$8 sps:$4 sm:$0xff]   ;;  %v1403_v23 = vld [vmem:[%s1858_s14 + $0x50] ss:$8 sps:$4 sm:$0xff]  }
  0x92   : > { %811 = vmatpush1.bf16.msra.mxu1 %v1380_v8  ;;  %771 = vmatprep.subr.bf16.mxu0 %v1381_v9  ;;  %v1398_v20 = vld [vmem:[%s1858_s14 + $0x140] ss:$8 sps:$4 sm:$0xff]   ;;  %v1401_v22 = vld [vmem:[%s1858_s14 + $0x154] ss:$8 sps:$4 sm:$0xff]   ;;  %v1404_v24 = vld [vmem:[%s1858_s14 + $0x150] ss:$8 sps:$4 sm:$0xff]  }
  0x93   : > { %812 = vmatprep.subr.bf16.mxu1 %v1383_v10  ;;  %v1405_v25 = vld [vmem:[%s1858_s14 + $0x64] ss:$8 sps:$4 sm:$0xff]   ;;  %v1409_v27 = vld [vmem:[%s1858_s14 + $0x60] ss:$8 sps:$4 sm:$0xff]   ;;  %v1411_v29 = vld [vmem:[%s1858_s14 + $0x74] ss:$8 sps:$4 sm:$0xff]  }
  0x94   : > { %v1407_v26 = vld [vmem:[%s1858_s14 + $0x164] ss:$8 sps:$4 sm:$0xff]   ;;  %v1410_v28 = vld [vmem:[%s1858_s14 + $0x160] ss:$8 sps:$4 sm:$0xff]   ;;  %v1413_v30 = vld [vmem:[%s1858_s14 + $0x174] ss:$8 sps:$4 sm:$0xff]  }
  0x95   : > { %772 = vmatpush1.bf16.msra.mxu0 %v1385_v11  ;;  %v1415_v31 = vld [vmem:[%s1858_s14 + $0x70] ss:$8 sps:$4 sm:$0xff]   ;;  %v1417_v33 = vld [vmem:[%s1858_s14 + $0x84] ss:$8 sps:$4 sm:$0xff]   ;;  %v1421_v35 = vld [vmem:[%s1858_s14 + $0x80] ss:$8 sps:$4 sm:$0xff]  }
  0x96   : > { %813 = vmatpush1.bf16.msra.mxu1 %v1386_v12  ;;  %773 = vmatprep.subr.bf16.mxu0 %v1387_v13  ;;  %v1416_v32 = vld [vmem:[%s1858_s14 + $0x170] ss:$8 sps:$4 sm:$0xff]   ;;  %v1419_v34 = vld [vmem:[%s1858_s14 + $0x184] ss:$8 sps:$4 sm:$0xff]   ;;  %v1422_v36 = vld [vmem:[%s1858_s14 + $0x180] ss:$8 sps:$4 sm:$0xff]  }
  0x97   : > { %814 = vmatprep.subr.bf16.mxu1 %v1389_v14  ;;  %v1423_v37 = vld [vmem:[%s1858_s14 + $0x94] ss:$8 sps:$4 sm:$0xff]   ;;  %v1664_v39 = vmov 1983009808   ;;  %v1427_v42 = vld [vmem:[%s1858_s14 + $0x90] ss:$8 sps:$4 sm:$0xff]  }
  0x98   : > { %v1425_v38 = vld [vmem:[%s1858_s14 + $0x194] ss:$8 sps:$4 sm:$0xff]   ;;  %v344_v40 = vunpack.c.l.s4 %v1664_v39  ;;  %v1428_v43 = vld [vmem:[%s1858_s14 + $0x190] ss:$8 sps:$4 sm:$0xff]   ;;  %v1429_v44 = vld [vmem:[%s1858_s14 + $0xa4] ss:$8 sps:$4 sm:$0xff]  }
  0x99   : > { %774 = vmatpush1.bf16.msra.mxu0 %v1391_v15  ;;  %v1431_v45 = vld [vmem:[%s1858_s14 + $0x1a4] ss:$8 sps:$4 sm:$0xff]   ;;  %v1911_v47 = vshrl.u32 %v346_v41, 7  ;;  %v1433_v48 = vld [vmem:[%s1858_s14 + $0xa0] ss:$8 sps:$4 sm:$0xff]   ;;  %p1245_p2 = scmp.ne.s32.totalorder %s1643_s21, 1 }
  0x9a   : > { %815 = vmatpush1.bf16.msra.mxu1 %v1392_v16  ;;  %775 = vmatprep.subr.bf16.mxu0 %v1393_v17  ;;  %v345_v46 = vunpack.c.0.s8 %v344_v40  ;;  %v1434_v49 = vld [vmem:[%s1858_s14 + $0x1a0] ss:$8 sps:$4 sm:$0xff]   ;;  %v1435_v50 = vld [vmem:[%s1858_s14 + $0xb4] ss:$8 sps:$4 sm:$0xff]   ;;  %v1439_v52 = vld [vmem:[%s1858_s14 + $0xb0] ss:$8 sps:$4 sm:$0xff]  }
  0x9b   : > { %816 = vmatprep.subr.bf16.mxu1 %v1395_v18  ;;  %v1437_v51 = vld [vmem:[%s1858_s14 + $0x1b4] ss:$8 sps:$4 sm:$0xff]   ;;  %v1440_v53 = vld [vmem:[%s1858_s14 + $0x1b0] ss:$8 sps:$4 sm:$0xff]   ;;  %v1465_v55 = vld [vmem:[%s1851_s28] ss:$8 sps:$4 sm:$0xff]  }
  0x9c   : > { %v348_v54 = vsub.s32 %v345_v46, %v1911_v47  ;;  %v1467_v56 = vld [vmem:[%s1851_s28 + $0x10] ss:$8 sps:$4 sm:$0xff]   ;;  %v1469_v57 = vld [vmem:[%s1851_s28 + $0x4] ss:$8 sps:$4 sm:$0xff]   ;;  %v1470_v60 = vld [vmem:[%s1851_s28 + $0x14] ss:$8 sps:$4 sm:$0xff]  }
  0x9d   : > { %776 = vmatpush1.bf16.msra.mxu0 %v1397_v19  ;;  %v1441_v58 = vld [vmem:[%s1858_s14 + $0xc4] ss:$8 sps:$4 sm:$0xff]   ;;  %v1445_v1 = vld [vmem:[%s1858_s14 + $0xc0] ss:$8 sps:$4 sm:$0xff]   ;;  %v1447_v4 = vld [vmem:[%s1858_s14 + $0xd4] ss:$8 sps:$4 sm:$0xff]  }
  0x9e   : > { %817 = vmatpush1.bf16.msra.mxu1 %v1398_v20  ;;  %777 = vmatprep.subr.bf16.mxu0 %v1399_v21  ;;  %v1443_v59 = vld [vmem:[%s1858_s14 + $0x1c4] ss:$8 sps:$4 sm:$0xff]   ;;  %v349_v61 = vrot.slane %v1465_v55, %v348_v54  ;;  %v363_v62 = vrot.slane %v1467_v56, %v348_v54  ;;  %v356_v63 = vrot.slane %v1469_v57, %v348_v54  ;;  %v1446_v2 = vld [vmem:[%s1858_s14 + $0x1c0] ss:$8 sps:$4 sm:$0xff]   ;;  %v1449_v5 = vld [vmem:[%s1858_s14 + $0x1d4] ss:$8 sps:$4 sm:$0xff]  }
  0x9f   : > { %818 = vmatprep.subr.bf16.mxu1 %v1401_v22  ;;  %v370_v0 = vrot.slane %v1470_v60, %v348_v54  ;;  %v1451_v9 = vld [vmem:[%s1858_s14 + $0xd0] ss:$8 sps:$4 sm:$0xff]   ;;  %v1453_v11 = vld [vmem:[%s1858_s14 + $0xe4] ss:$8 sps:$4 sm:$0xff]   ;;  %v1457_v13 = vld [vmem:[%s1858_s14 + $0xe0] ss:$8 sps:$4 sm:$0xff]  }
  0xa0   : > { %v372_v3 = vcombine.high %v349_v61, %v363_v62  ;;  %v1452_v10 = vld [vmem:[%s1858_s14 + $0x1d0] ss:$8 sps:$4 sm:$0xff]   ;;  %v1455_v12 = vld [vmem:[%s1858_s14 + $0x1e4] ss:$8 sps:$4 sm:$0xff]   ;;  %v1458_v14 = vld [vmem:[%s1858_s14 + $0x1e0] ss:$8 sps:$4 sm:$0xff]   ;;  %v371_v17 = vcombine.low %v349_v61, %v363_v62 }
  0xa1   : > { %778 = vmatpush1.bf16.msra.mxu0 %v1403_v23  ;;  %v374_v6 = vcombine.high %v356_v63, %v370_v0  ;;  %v1459_v15 = vld [vmem:[%s1858_s14 + $0xf4] ss:$8 sps:$4 sm:$0xff]   ;;  %v373_v18 = vcombine.low %v356_v63, %v370_v0  ;;  %v1463_v19 = vld [vmem:[%s1858_s14 + $0xf0] ss:$8 sps:$4 sm:$0xff]   ;;  %v1473_v39 = vld [vmem:[#allocation8 + $0x48] sm:$0xff] (!%p1245_p2)   ;;  %v867_v46 = vsub.s32 (!%p1245_p2), 1, %v1911_v47 }
  0xa2   : > { %819 = vmatpush1.bf16.msra.mxu1 %v1404_v24  ;;  %779 = vmatprep.subr.bf16.mxu0 %v1405_v25  ;;  %v380_v7 = vpack.c.bf16 %v372_v3, %v372_v3  ;;  %v1461_v16 = vld [vmem:[%s1858_s14 + $0x1f4] ss:$8 sps:$4 sm:$0xff]   ;;  %v1464_v20 = vld [vmem:[%s1858_s14 + $0x1f0] ss:$8 sps:$4 sm:$0xff]   ;;  %v379_v21 = vpack.c.bf16 %v371_v17, %v371_v17  ;;  %v1474_v40 = vld [vmem:[#allocation8 + $0x8] sm:$0xff] (!%p1245_p2)  }
  0xa3   : > { %820 = vmatprep.subr.bf16.mxu1 %v1407_v26  ;;  %v382_v8 = vpack.c.bf16 %v374_v6, %v374_v6  ;;  %v381_v22 = vpack.c.bf16 %v373_v18, %v373_v18  ;;  %v329_v24 = vld [vmem:[#allocation2] sm:$0xff]  ;;  %v1482_v55 = vld [vmem:[#allocation8 + $0x28] sm:$0xff] (!%p1245_p2)   ;;  %v1485_v62 = vld [vmem:[#allocation8 + $0x78] sm:$0xff] (!%p1245_p2)  }
  0xa4   : > { %799 = vmatprep.mubr.bf16.mxu0 %v380_v7  ;;  %v1475_v41 = vld [vmem:[#allocation8 + $0x50] sm:$0xff] (!%p1245_p2)   ;;  %v1486_v0 = vld [vmem:[#allocation8 + $0x38] sm:$0xff] (!%p1245_p2)  }
  0xa5   : > { %780 = vmatpush1.bf16.msra.mxu0 %v1409_v27  ;;  %840 = vmatprep.mubr.bf16.mxu1 %v382_v8  ;;  %v1246_v3 = vld [vmem:[%s1985_s4] ss:$0 sm:$0xff] (!%p1245_p2) }
  0xa6   : > { %821 = vmatpush1.bf16.msra.mxu1 %v1410_v28  ;;  %781 = vmatprep.subr.bf16.mxu0 %v1411_v29  ;;  %v330_v28 = vld [vmem:[#allocation2 + $0x8] sm:$0xff] }
  0xa7   : > { %822 = vmatprep.subr.bf16.mxu1 %v1413_v30 }
  0xa9   : > { %782 = vmatpush1.bf16.msra.mxu0 %v1415_v31 }
  0xaa   : > { %823 = vmatpush1.bf16.msra.mxu1 %v1416_v32  ;;  %783 = vmatprep.subr.bf16.mxu0 %v1417_v33 }
  0xab   : > { %824 = vmatprep.subr.bf16.mxu1 %v1419_v34 }
  0xad   : > { %784 = vmatpush1.bf16.msra.mxu0 %v1421_v35 }
  0xae   : > { %825 = vmatpush1.bf16.msra.mxu1 %v1422_v36  ;;  %785 = vmatprep.subr.bf16.mxu0 %v1423_v37  ;;  %v1471_v37 = vld [vmem:[#allocation8 + $0x40] sm:$0xff] (!%p1245_p2)  }
  0xaf   : > { %826 = vmatprep.subr.bf16.mxu1 %v1425_v38  ;;  %v1472_v38 = vld [vmem:[#allocation8] sm:$0xff] (!%p1245_p2)  }
  0xb1   : > { %786 = vmatpush1.bf16.msra.mxu0 %v1427_v42  ;;  %v1476_v42 = vld [vmem:[#allocation8 + $0x10] sm:$0xff] (!%p1245_p2)  }
  0xb2   : > { %827 = vmatpush1.bf16.msra.mxu1 %v1428_v43  ;;  %787 = vmatprep.subr.bf16.mxu0 %v1429_v44  ;;  %v1477_v43 = vld [vmem:[#allocation8 + $0x58] sm:$0xff] (!%p1245_p2)  }
  0xb3   : > { %828 = vmatprep.subr.bf16.mxu1 %v1431_v45  ;;  %v1478_v44 = vld [vmem:[#allocation8 + $0x18] sm:$0xff] (!%p1245_p2)   ;;  %v1479_v45 = vld [vmem:[#allocation8 + $0x60] sm:$0xff] (!%p1245_p2)  }
  0xb5   : > { %788 = vmatpush1.bf16.msra.mxu0 %v1433_v48  ;;  %v863_v48 = vsub.s32 (!%p1245_p2), 0, %v1911_v47  ;;  %v1484_v47 = vld [vmem:[#allocation8 + $0x30] sm:$0xff] (!%p1245_p2)  }
  0xb6   : > { %829 = vmatpush1.bf16.msra.mxu1 %v1434_v49  ;;  %789 = vmatprep.subr.bf16.mxu0 %v1435_v50  ;;  %v1480_v49 = vld [vmem:[#allocation8 + $0x20] sm:$0xff] (!%p1245_p2)   ;;  %v1481_v50 = vld [vmem:[#allocation8 + $0x68] sm:$0xff] (!%p1245_p2)  }
  0xb7   : > { %830 = vmatprep.subr.bf16.mxu1 %v1437_v51 }
  0xb9   : > { %790 = vmatpush1.bf16.msra.mxu0 %v1439_v52  ;;  %v859_v52 = vld [vmem:[%s1983_s2] sm:$0x3] (!%p1245_p2) }
  0xba   : > { %831 = vmatpush1.bf16.msra.mxu1 %v1440_v53  ;;  %791 = vmatprep.subr.bf16.mxu0 %v1441_v58  ;;  %v868_v53 = vrot.slane (!%p1245_p2), %v859_v52, %v867_v46  ;;  %v864_v54 = vrot.slane (!%p1245_p2), %v859_v52, %v863_v48  ;;  %v1483_v58 = vld [vmem:[#allocation8 + $0x70] sm:$0xff] (!%p1245_p2)  }
  0xbb   : > { %832 = vmatprep.subr.bf16.mxu1 %v1443_v59 }
  0xbd   : > { %792 = vmatpush1.bf16.msra.mxu0 %v1445_v1 }
  0xbe   : > { %833 = vmatpush1.bf16.msra.mxu1 %v1446_v2  ;;  %793 = vmatprep.subr.bf16.mxu0 %v1447_v4 }
  0xbf   : > { %834 = vmatprep.subr.bf16.mxu1 %v1449_v5 }
  0xc1   : > { %794 = vmatpush1.bf16.msra.mxu0 %v1451_v9 }
  0xc2   : > { %835 = vmatpush1.bf16.msra.mxu1 %v1452_v10  ;;  %795 = vmatprep.subr.bf16.mxu0 %v1453_v11 }
  0xc3   : > { %836 = vmatprep.subr.bf16.mxu1 %v1455_v12 }
  0xc5   : > { %796 = vmatpush1.bf16.msra.mxu0 %v1457_v13 }
  0xc6   : > { %837 = vmatpush1.bf16.msra.mxu1 %v1458_v14  ;;  %797 = vmatprep.subr.bf16.mxu0 %v1459_v15 }
  0xc7   : > { %838 = vmatprep.subr.bf16.mxu1 %v1461_v16 }
  0xc9   : > { %798 = vmatpush1.bf16.msra.mxu0 %v1463_v19 }
  0xca   : > { %839 = vmatpush1.bf16.msra.mxu1 %v1464_v20  ;;  %1270 = vmatprep.subr.bf16.mxu0 (!%p1245_p2), %v1471_v37 }
  0xcc   : > { %800 = vmatmul.mubr.bf16.vlgmr.msra.gmra.mrb[0].mxu0 %v379_v21 }
  0xcd   : > { %841 = vmatmul.mubr.bf16.vlgmr.msra.gmra.mrb[0].mxu1 %v381_v22  ;;  %1271 = vmatpush3.bf16.msra.mxu0 (!%p1245_p2), %v1472_v38 }
  0xce   : > { %1272 = vmatprep.subr.bf16.mxu0 (!%p1245_p2), %v1473_v39 }
  0xd1   : > { %1273 = vmatpush3.bf16.msra.mxu0 (!%p1245_p2), %v1474_v40 }
  0xd2   : > { %1274 = vmatprep.subr.bf16.mxu0 (!%p1245_p2), %v1475_v41 }
  0xd5   : > { %1275 = vmatpush3.bf16.msra.mxu0 (!%p1245_p2), %v1476_v42 }
  0xd6   : > { %1276 = vmatprep.subr.bf16.mxu0 (!%p1245_p2), %v1477_v43 }
  0xd9   : > { %1277 = vmatpush3.bf16.msra.mxu0 (!%p1245_p2), %v1478_v44 }
  0xda   : > { %1278 = vmatprep.subr.bf16.mxu0 (!%p1245_p2), %v1479_v45 }
  0xdd   : > { %1279 = vmatpush3.bf16.msra.mxu0 (!%p1245_p2), %v1480_v49 }
  0xde   : > { %1280 = vmatprep.subr.bf16.mxu0 (!%p1245_p2), %v1481_v50 }
  0xe1   : > { %1281 = vmatpush3.bf16.msra.mxu0 (!%p1245_p2), %v1482_v55 }
  0xe2   : > { %1282 = vmatprep.subr.bf16.mxu0 (!%p1245_p2), %v1483_v58 }
  0xe5   : > { %1283 = vmatpush3.bf16.msra.mxu0 (!%p1245_p2), %v1484_v47 }
  0xe6   : > { %1284 = vmatprep.subr.bf16.mxu0 (!%p1245_p2), %v1485_v62 }
  0xe9   : > { %1285 = vmatpush3.bf16.msra.mxu0 (!%p1245_p2), %v1486_v0 }
 0x19f   : > { %v801_v23 = vpop.f32.mrb[0].mxu0 }
 0x1a0   : > { %v842_v25 = vpop.f32.mrb[0].mxu1  ;;  %v803_v27 = vpop.f32.mrb[1].mxu0  ;;  %856 = sbr.rel (%p1245_p2) target bundleno = 655 (0x28f), region = 60 }
 0x1a1   : > { %v843_v26 = vadd.f32 %v842_v25, %v801_v23  ;;  %v844_v29 = vpop.f32.mrb[1].mxu1  ;;  %v805_v31 = vpop.f32.mrb[2].mxu0 }
 0x1a2   : > { %v845_v30 = vadd.f32 %v844_v29, %v803_v27  ;;  %v846_v32 = vpop.f32.mrb[2].mxu1  ;;  %v806_v34 = vpop.f32.mrb[3].mxu0 }
 0x1a3   : > { %v849_v33 = vadd.f32 %v843_v26, %v329_v24  ;;  %v847_v35 = vpop.f32.mrb[3].mxu1 }
 0x1a4   : > { %v850_v36 = vadd.f32 %v845_v30, %v330_v28 }
 0x1a5   : > { %851 = vst [vmem:[#allocation2] sm:$0xff] %v849_v33 }
 0x1a6   : > { %852 = vst [vmem:[#allocation2 + $0x8] sm:$0xff] %v850_v36 }
 0x1ac   : > { %v857_v57 = vld [vmem:[#allocation2] sm:$0xff] }
 0x1ad   : > { %v858_v51 = vld [vmem:[#allocation2 + $0x8] sm:$0xff]  ;;  %v871_v60 = vadd.f32 %v864_v54, %v857_v57 }
 0x1ae   : > { %v872_v56 = vadd.f32 %v868_v53, %v858_v51 }
 0x1af   : > { %v873_v63 = vmax.f32 %v871_v60, 0.0 }
 0x1b0   : > { %v874_v59 = vmax.f32 %v872_v56, 0.0 }
 0x1b1   : > { %v875_v1 = vpack.c.bf16 %v873_v63, %v873_v63 }
 0x1b2   : > { %v876_v61 = vpack.c.bf16 %v874_v59, %v874_v59 }
 0x1b4   : > { %1044 = vmatprep.mubr.bf16.mxu0 %v876_v61 }
 0x1b5   : > { %1045 = vmatmul.mubr.bf16.vlgmr.msra.gmra.mrb[0].mxu0 %v875_v1 }
 0x288   : > { %v1286_v2 = vpop.f32.mrb[0].mxu0 }
 0x289   : > { %v1287_v4 = vpop.f32.mrb[1].mxu0 }
 0x28a   : > { %v1288_v5 = vadd.f32 %v1287_v4, %v1286_v2  ;;  %v1289_v6 = vpop.f32.mrb[2].mxu0 }
 0x28b   : > { %v1290_v7 = vpop.f32.mrb[3].mxu0 }
 0x28c   : > { %v1047_v8 = vadd.f32 %v1288_v5, %v1246_v3 }
 0x28e   : > { %1052 = vst [vmem:[#allocation9] sm:$0xff] %v1047_v8 }
 0x28f PF: > { %p1263_p4 = scmp.ne.s32.totalorder %s1727_s24, 1 }
 0x291   : > { %1055 = sbr.rel (%p1263_p4) target bundleno = 683 (0x2ab), region = 64 }
 0x298   : > { %1061 = vsyncadd [#allocation5], 96  ;;  %s1665_s26 = smov [#allocation9]  }
 0x299   : > { %s1066_s7 = sshll.u32 %s1665_s26, 4  ;;  %s1067_s7 = int_to_ptr.vmem [resolvable:$true] %s1066_s7 }
 0x29a   : > { %s1567_s11 = scalar_lea.vmem %s1067_s7, 32  ;;  %s1571_s13 = scalar_lea.vmem %s1067_s7, 128 }
 0x29b   : > { %p1568_p6 = scmp.ne.s32.totalorder %s1067_s7, %s1567_s11  ;;  %p1572_p7 = scmp.lt.s32.totalorder %s1067_s7, %s1067_s7 }
 0x29c   : > { %p1573_p9 = scmp.lt.s32.totalorder %s1571_s13, %s1567_s11 }
 0x29e   : > { %p1574_p11 = por %p1573_p9, %p1572_p7 }
 0x2a0   : > { %p1575_p13 = pnand %p1574_p11, %p1568_p6 }
 0x2a2   : > { %1578 = shalt.err (!%p1575_p13)
}
 0x2a3   : > { %s1579_s16 = scalar_lea.hbm %s1986_s5, 32 }
 0x2a4   : > { %p1580_p3 = scmp.ne.s32.totalorder %s1986_s5, %s1579_s16  ;;  %p1583_p8 = scmp.lt.u32.totalorder %s1579_s16, %s1986_s5 }
 0x2a6   : > { %p1585_p5 = pnand %p1583_p8, %p1580_p3 }
 0x2a8   : > { %1588 = shalt.err (!%p1585_p5)
}
 0x2a9   : > { %s1666_s9 = smov 32   ;;  %s1667_s12 = smov 2  }
 0x2aa   : > { %1072 = dma.vmem_to_hbm [thread:$0]  %s1067_s7, 32, %s1986_s5, [#allocation5], %s1666_s9, %s1666_s9, %s1667_s12  }
 0x2ab PF: > { %p1307_p10 = scmp.eq.s32.totalorder %s1727_s24, 1 }
 0x2ad   : > { %1626 = dma.done.wait (%p1307_p10), [#allocation5], 128  }
 0x2ae   : > { %1628 = vsyncadd (%p1307_p10), [#allocation5], 4294967168 }
 0x2af PF: > { %s22_s23 = sadd.s32 1, %s1651_s23   ;;  %s2001_s18 = smov %s1635_s19 }
 0x2b0   : > { %p19_p1 = scmp.ge.s32.totalorder %s22_s23, 4   ;;  %s2002_s19 = smov %s1639_s20 }
 0x2b1   : > { %s2003_s20 = smov %s1753_s30  ;;  %s2004_s21 = smov %s1647_s22 }
 0x2b2   : > { %s2005_s22 = smov %s2007_s25  ;;  %21 = sbr.rel (!%p19_p1) target bundleno = 7 (0x7), region = 103 }
 0x2b9   :  { %1082 = vsyncpa [#allocation4], 1 }
 0x2ba   :  { %1084 = vsyncpa [#allocation4 + $0x1], 1 }
 0x2bb   :  { %1085 = vsyncpa [#allocation7], 1 }
 0x2bc   :  { %1087 = vsyncpa [#allocation7 + $0x1], 1 }
 0x2bd   :  { %1088 = vsyncpa [#allocation5], 1 }
 0x2be   :  { %1090 = vsyncpa [#allocation5 + $0x1], 1 }

// kernel: tpu_custom_call.1
= control target key start
LH: loop header
LB: loop body
LE: loop exit
PB: predicated region body
PF: predicated region fallthrough
CT: control target
= control target key end

     0   :  { %10 = vsyncpa [#allocation4], 0  ;;  %s1981_s0 = inlined_call_operand.hbm [shape: f32[2,1024], index: 0, kind: input, shape index: {}]   ;;  %s1982_s1 = inlined_call_operand.hbm [shape: bf16[1024,256], index: 1, kind: input, shape index: {}]   ;;  %s1983_s2 = inlined_call_operand.vmem [shape: f32[1,256], index: 2, kind: input, shape index: {}]   ;;  %s1984_s3 = inlined_call_operand.hbm [shape: bf16[256,128], index: 3, kind: input, shape index: {}]   ;;  %s1985_s4 = inlined_call_operand.vmem [shape: f32[1,128], index: 4, kind: input, shape index: {}]   ;;  %s1986_s5 = inlined_call_operand.hbm [shape: f32[2,128], index: 5, kind: output, shape index: {}]  }
   0x1   :  { %12 = vsyncpa [#allocation4 + $0x1], 0 }
   0x2   :  { %13 = vsyncpa [#allocation7], 0 }
   0x3   :  { %15 = vsyncpa [#allocation7 + $0x1], 0 }
   0x4   :  { %16 = vsyncpa [#allocation5], 0  ;;  %s1698_s18 = smov 0   ;;  %s1700_s19 = smov 0  }
   0x5   :  { %s1702_s20 = smov 0   ;;  %s1704_s21 = smov 0  }
   0x6   :  { %s1706_s22 = smov 0   ;;  %s1708_s23 = smov 0  }
   0x7 LB: > { %s1727_s24 = sadd.s32 4294967295, %s1651_s23   ;;  %s31_s25 = sadd.s32 1, %s1647_s22  ;;  %s1651_s23 = sphi %s1708_s23, %s22_s23   ;;  %s1647_s22 = sphi %s1706_s22, %s2005_s22   ;;  %s1643_s21 = sphi %s1704_s21, %s2004_s21   ;;  %s1639_s20 = sphi %s1702_s20, %s2003_s20   ;;  %s1635_s19 = sphi %s1700_s19, %s2002_s19   ;;  %s1631_s18 = sphi %s1698_s18, %s2001_s18  }
   0x8   : > { %p32_p0 = scmp.ge.s32.totalorder %s31_s25, 2  ;;  %s43_s26 = sadd.s32 1, %s1639_s20 }
   0x9   : > { %p50_p1 = scmp.ne.s32.totalorder %s1639_s20, %s1635_s19  ;;  %p51_p2 = scmp.eq.s32.totalorder %s1651_s23, 0 }
   0xa   : > { %s2007_s25 = smov (%p32_p0, %s31_s25), 0  ;;  %p56_p4 = scmp.ne.s32.totalorder %s1635_s19, %s1631_s18 }
   0xb   : > { %p1736_p3 = por %p51_p2, %p50_p1  ;;  %s39_s28 = ssub.s32 %s1647_s22, %s2007_s25 }
   0xc   : > { %p1987_p5 = scmp.eq.s32.totalorder %s1727_s24, 0  ;;  %p41_p6 = scmp.eq.s32.totalorder %s39_s28, 0 }
   0xd   : > { %s1991_s27 = scalar_select %p1736_p3, 1, 0 }
   0xe   : > { %p1166_p7 = scmp.ge.s32.totalorder %s1651_s23, 1  ;;  %p1747_p8 = por %p1987_p5, %p56_p4 }
   0xf   : > { %p182_p9 = scmp.lt.s32.totalorder %s1651_s23, 3  ;;  %s1653_s7 = smov [#allocation8]  }
  0x10   : > { %s1992_s29 = scalar_select %p1747_p8, 1, 0 }
  0x11   : > { %s1753_s30 = scalar_select %p41_p6, %s1639_s20, %s43_s26  }
  0x12   : > { %p1755_p10 = pnand %p1166_p7, %p182_p9  ;;  %s197_s8 = sshll.u32 %s1653_s7, 4  ;;  %s198_s8 = int_to_ptr.vmem [resolvable:$true] %s197_s8 }
  0x13   : > { %s1487_s12 = scalar_lea.hbm %s1984_s3, 2048 }
  0x14   : > { %s1993_s6 = scalar_select %p1755_p10, 1, 0 }
  0x15   : > { %p1301_p11 = pneg %p1755_p10  ;;  %p1488_p13 = scmp.ne.s32.totalorder %s1984_s3, %s1487_s12 }
  0x16   : > { %p1494_p4 = scmp.lt.u32.totalorder %s1487_s12, %s1984_s3 }
  0x17   : > { %p1763_p12 = pnand %p1301_p11, %p1987_p5 }
  0x19   : > { %p1489_p0 = pneg %p1763_p12 }
  0x1b   : > { %p1490_p1 = pnand %p1489_p0, %p1488_p13 }
  0x1d   : > { %p1491_p2 = pneg %p1490_p1 }
  0x1f   : > { %p1496_p6 = pnand %p1494_p4, %p1491_p2 }
  0x21   : > { %1499 = shalt.err (!%p1496_p6)
}
  0x22   : > { %s1500_s17 = scalar_lea.vmem %s198_s8, 2048  ;;  %p1508_p5 = scmp.lt.s32.totalorder %s198_s8, %s198_s8 }
  0x23   : > { %p1501_p7 = scmp.ne.s32.totalorder %s198_s8, %s1500_s17  ;;  %p1509_p8 = scmp.lt.s32.totalorder %s1500_s17, %s1500_s17 }
  0x25   : > { %p1503_p9 = pnand %p1501_p7, %p1489_p0  ;;  %p1510_p10 = por %p1509_p8, %p1508_p5 }
  0x27   : > { %p1504_p11 = pneg %p1503_p9 }
  0x29   : > { %p1511_p3 = pnand %p1510_p10, %p1504_p11 }
  0x2b   : > { %1514 = shalt.err (!%p1511_p3)
}
  0x2c   : > { %s1654_s18 = smov 64   ;;  %s1655_s26 = smov 4  }
  0x2d   : > { %1304 = dma.hbm_to_vmem [thread:$0]  (!%p1763_p12), %s1984_s3, 2048, %s198_s8, [#allocation7], %s1654_s18, %s1654_s18, %s1655_s26  }
  0x2e   : > { %p1168_p13 = scmp.ge.s32.totalorder %s1651_s23, 2 }
  0x2f   : > { %p1995_p1 = scmp.ne.s32.totalorder (!%p1168_p13), %s1991_s27, 0 }
  0x30   : > { %210 = sbr.rel (%p1168_p13) target bundleno = 114 (0x72), region = 28 }
  0x37   : > { %213 = sbr.rel (!%p1995_p1) target bundleno = 87 (0x57), region = 32  ;;  %s214_s10 = sand.u32 (%p1995_p1), 1, %s1639_s20  }
  0x38   : > { %s1169_s11 = sshll.u32 (%p1995_p1), %s214_s10, 5  ;;  %s1787_s12 = scalar_lea.sflag (%p1995_p1), [#allocation4], %s214_s10 }
  0x39   : > { %s218_s13 = scalar_lea.vmem (%p1995_p1), [#allocation3], %s1169_s11 }
  0x3e   : > { %226 = vsyncadd %s1787_s12, 384  ;;  %s1267_s9 = sshll.u32 %s1647_s22, 7  ;;  %s233_s14 = sshll.u32 %s218_s13, 4  ;;  %s1796_s14 = int_to_ptr.vmem [resolvable:$true] %s233_s14 }
  0x3f   : > { %s1794_s8 = scalar_lea.hbm %s1981_s0, %s1267_s9  ;;  %s1517_s28 = scalar_lea.hbm %s1981_s0, 256 }
  0x40   : > { %s1515_s17 = scalar_lea.hbm %s1794_s8, 128  ;;  %p1518_p5 = scmp.lt.u32.totalorder %s1794_s8, %s1981_s0 }
  0x41   : > { %p1516_p3 = scmp.ne.s32.totalorder %s1794_s8, %s1515_s17  ;;  %p1519_p8 = scmp.lt.u32.totalorder %s1517_s28, %s1515_s17 }
  0x42   : > { %p1521_p12 = scmp.lt.u32.totalorder %s1515_s17, %s1794_s8 }
  0x43   : > { %p1520_p10 = por %p1519_p8, %p1518_p5 }
  0x45   : > { %p1522_p0 = por %p1521_p12, %p1520_p10 }
  0x47   : > { %p1523_p2 = pnand %p1522_p0, %p1516_p3 }
  0x49   : > { %1526 = shalt.err (!%p1523_p2)
}
  0x4a   : > { %s1527_s11 = scalar_lea.vmem %s1796_s14, 128  ;;  %s1656_s13 = smov [#allocation3]  }
  0x4b   : > { %p1528_p4 = scmp.ne.s32.totalorder %s1796_s14, %s1527_s11  ;;  %s1529_s9 = sshll.u32 %s1656_s13, 4  ;;  %s1530_s9 = int_to_ptr.vmem [resolvable:$false] %s1529_s9 }
  0x4c   : > { %s1531_s15 = scalar_lea.vmem %s1530_s9, 1024  ;;  %p1532_p6 = scmp.lt.s32.totalorder %s1796_s14, %s1530_s9 }
  0x4d   : > { %p1533_p7 = scmp.lt.s32.totalorder %s1531_s15, %s1527_s11 }
  0x4f   : > { %p1534_p9 = por %p1533_p7, %p1532_p6 }
  0x51   : > { %p1535_p11 = pnand %p1534_p9, %p1528_p4 }
  0x53   : > { %1538 = shalt.err (!%p1535_p11)
}
  0x54   : > { %s1657_s16 = smov 256   ;;  %s1658_s17 = smov 128  }
  0x55   : > { %s1659_s18 = smov 8  }
  0x56   : > { %239 = dma.hbm_to_vmem [thread:$0]  %s1794_s8, 128, %s1796_s14, %s1787_s12, %s1657_s16, %s1658_s17, %s1659_s18  }
  0x57 PF: > { %s243_s26 = sand.u32 1, %s1651_s23   ;;  %s245_s28 = sand.u32 1, %s1639_s20  }
  0x58   : > { %s1172_s7 = sshll.u32 %s245_s28, 9  ;;  %s1269_s10 = sshll.u32 %s1647_s22, 13 }
  0x59   : > { %s1820_s9 = scalar_lea.hbm %s1982_s1, %s1269_s10  ;;  %s247_s15 = scalar_lea.vmem [#allocation6], %s1172_s7 }
  0x5a   : > { %s255_s12 = sshll.u32 %s247_s15, 4  ;;  %s1824_s14 = scalar_lea.sflag [#allocation7], %s243_s26  ;;  %s1822_s12 = int_to_ptr.vmem [resolvable:$true] %s255_s12 }
  0x5b   : > { %s1539_s8 = scalar_lea.hbm %s1820_s9, 8192  ;;  %p1996_p1 = scmp.ne.s32.totalorder %s1991_s27, 0 }
  0x5c   : > { %p1540_p13 = scmp.ne.s32.totalorder %s1820_s9, %s1539_s8  ;;  %s1543_s18 = scalar_lea.hbm %s1982_s1, 16384 }
  0x5d   : > { %p1544_p8 = scmp.lt.u32.totalorder %s1820_s9, %s1982_s1  ;;  %p1545_p10 = scmp.lt.u32.totalorder %s1543_s18, %s1539_s8 }
  0x5e   : > { %p1541_p3 = pnand %p1540_p13, %p1996_p1  ;;  %p1547_p0 = scmp.lt.u32.totalorder %s1539_s8, %s1820_s9 }
  0x5f   : > { %p1546_p12 = por %p1545_p10, %p1544_p8 }
  0x60   : > { %p1542_p5 = pneg %p1541_p3 }
  0x61   : > { %p1548_p2 = por %p1547_p0, %p1546_p12 }
  0x63   : > { %p1549_p4 = pnand %p1548_p2, %p1542_p5 }
  0x65   : > { %1552 = shalt.err (!%p1549_p4)
}
  0x66   : > { %s1553_s26 = scalar_lea.vmem %s1822_s12, 8192  ;;  %s1660_s7 = smov [#allocation6]  }
  0x67   : > { %p1554_p6 = scmp.ne.s32.totalorder %s1822_s12, %s1553_s26  ;;  %s1557_s11 = sshll.u32 %s1660_s7, 4  ;;  %s1558_s11 = int_to_ptr.vmem [resolvable:$false] %s1557_s11 }
  0x68   : > { %s1559_s13 = scalar_lea.vmem %s1558_s11, 16384  ;;  %p1560_p11 = scmp.lt.s32.totalorder %s1822_s12, %s1558_s11 }
  0x69   : > { %p1555_p7 = pnand %p1554_p6, %p1996_p1  ;;  %p1561_p13 = scmp.lt.s32.totalorder %s1559_s13, %s1553_s26 }
  0x6b   : > { %p1556_p9 = pneg %p1555_p7  ;;  %p1562_p3 = por %p1561_p13, %p1560_p11 }
  0x6d   : > { %p1563_p8 = pnand %p1562_p3, %p1556_p9 }
  0x6f   : > { %1566 = shalt.err (!%p1563_p8)
}
  0x70   : > { %s1661_s15 = smov 128   ;;  %s1662_s8 = smov 8  }
  0x71   : > { %1294 = dma.hbm_to_vmem [thread:$0]  (%p1996_p1), %s1820_s9, 8192, %s1822_s12, %s1824_s14, %s1661_s15, %s1661_s15, %s1662_s8  }
  0x72 PF: > { %p1997_p5 = scmp.ne.s32.totalorder %s1993_s6, 0 }
  0x73   : > { %s269_s16 = sand.u32 (!%p1997_p5), 1, %s1635_s19   ;;  %p1998_p10 = scmp.ne.s32.totalorder (!%p1997_p5), %s1992_s29, 0 }
  0x74   : > { %267 = sbr.rel (%p1997_p5) target bundleno = 687 (0x2af), region = 40  ;;  %s1177_s17 = sshll.u32 (!%p1997_p5), %s269_s16, 5 }
  0x75   : > { %s270_s18 = scalar_lea.sflag (!%p1997_p5), [#allocation4], %s269_s16  ;;  %s1851_s28 = scalar_lea.vmem (!%p1997_p5), [#allocation3], %s1177_s17 }
  0x7b   : > { %1614 = dma.done.wait (%p1998_p10), %s270_s18, 512  }
  0x7c   : > { %1616 = vsyncadd (%p1998_p10), %s270_s18, 4294966784  ;;  %s278_s27 = sand.u32 1, %s1727_s24   ;;  %s1178_s9 = sshll.u32 %s269_s16, 9 }
  0x7d   : > { %s279_s12 = scalar_lea.sflag [#allocation7], %s278_s27  ;;  %s1858_s14 = scalar_lea.vmem [#allocation6], %s1178_s9 }
  0x7e   : > { %1618 = dma.done.wait (%p1998_p10), %s279_s12, 8192  }
  0x7f   : > { %1620 = vsyncadd (%p1998_p10), %s279_s12, 4294959104  ;;  %p1999_p1 = scmp.eq.s32.totalorder %s1727_s24, 0 }
  0x81   : > { %1622 = dma.done.wait (%p1999_p1), [#allocation7], 2048   ;;  %p2000_p12 = pmov %p1999_p1 }
  0x82   : > { %p1180_p0 = scmp.ne.s32.totalorder %s1643_s21, 0 }
  0x83   : > { %1624 = vsyncadd (%p2000_p12), [#allocation7], 4294965248  ;;  %v1663_v0 = vmov (!%p1180_p0), 0.0  }
  0x84   : > { %326 = sbr.rel (%p1180_p0) target bundleno = 139 (0x8b), region = 56  ;;  %327 = vst [vmem:[#allocation2] sm:$0xff] (!%p1180_p0), %v1663_v0  ;;  %328 = vst [vmem:[#allocation2 + $0x8] sm:$0xff] (!%p1180_p0), %v1663_v0 }
  0x8b PF: > { %v1369_v1 = vld [vmem:[%s1858_s14 + $0x4] ss:$8 sps:$4 sm:$0xff]   ;;  %v1373_v3 = vld [vmem:[%s1858_s14] ss:$8 sps:$4 sm:$0xff]   ;;  %v1375_v5 = vld [vmem:[%s1858_s14 + $0x14] ss:$8 sps:$4 sm:$0xff]   ;;  %v346_v41 = vlaneseq }
  0x8c   : > { %v1371_v2 = vld [vmem:[%s1858_s14 + $0x104] ss:$8 sps:$4 sm:$0xff]   ;;  %767 = vmatprep.subr.bf16.mxu0 %v1369_v1  ;;  %v1374_v4 = vld [vmem:[%s1858_s14 + $0x100] ss:$8 sps:$4 sm:$0xff]   ;;  %v1377_v6 = vld [vmem:[%s1858_s14 + $0x114] ss:$8 sps:$4 sm:$0xff]  }
  0x8d   : > { %808 = vmatprep.subr.bf16.mxu1 %v1371_v2  ;;  %768 = vmatpush1.bf16.msra.mxu0 %v1373_v3  ;;  %v1379_v7 = vld [vmem:[%s1858_s14 + $0x10] ss:$8 sps:$4 sm:$0xff]   ;;  %v1381_v9 = vld [vmem:[%s1858_s14 + $0x24] ss:$8 sps:$4 sm:$0xff]   ;;  %v1385_v11 = vld [vmem:[%s1858_s14 + $0x20] ss:$8 sps:$4 sm:$0xff]  }
  0x8e   : > { %809 = vmatpush1.bf16.msra.mxu1 %v1374_v4  ;;  %769 = vmatprep.subr.bf16.mxu0 %v1375_v5  ;;  %v1380_v8 = vld [vmem:[%s1858_s14 + $0x110] ss:$8 sps:$4 sm:$0xff]   ;;  %v1383_v10 = vld [vmem:[%s1858_s14 + $0x124] ss:$8 sps:$4 sm:$0xff]   ;;  %v1386_v12 = vld [vmem:[%s1858_s14 + $0x120] ss:$8 sps:$4 sm:$0xff]  }
  0x8f   : > { %810 = vmatprep.subr.bf16.mxu1 %v1377_v6  ;;  %v1387_v13 = vld [vmem:[%s1858_s14 + $0x34] ss:$8 sps:$4 sm:$0xff]   ;;  %v1391_v15 = vld [vmem:[%s1858_s14 + $0x30] ss:$8 sps:$4 sm:$0xff]   ;;  %v1393_v17 = vld [vmem:[%s1858_s14 + $0x44] ss:$8 sps:$4 sm:$0xff]  }
  0x90   : > { %v1389_v14 = vld [vmem:[%s1858_s14 + $0x134] ss:$8 sps:$4 sm:$0xff]   ;;  %v1392_v16 = vld [vmem:[%s1858_s14 + $0x130] ss:$8 sps:$4 sm:$0xff]   ;;  %v1395_v18 = vld [vmem:[%s1858_s14 + $0x144] ss:$8 sps:$4 sm:$0xff]  }
  0x91   : > { %770 = vmatpush1.bf16.msra.mxu0 %v1379_v7  ;;  %v1397_v19 = vld [vmem:[%s1858_s14 + $0x40] ss:$8 sps:$4 sm:$0xff]   ;;  %v1399_v21 = vld [vmem:[%s1858_s14 + $0x54] ss:$8 sps:$4 sm:$0xff]   ;;  %v1403_v23 = vld [vmem:[%s1858_s14 + $0x50] ss:$8 sps:$4 sm:$0xff]  }
  0x92   : > { %811 = vmatpush1.bf16.msra.mxu1 %v1380_v8  ;;  %771 = vmatprep.subr.bf16.mxu0 %v1381_v9  ;;  %v1398_v20 = vld [vmem:[%s1858_s14 + $0x140] ss:$8 sps:$4 sm:$0xff]   ;;  %v1401_v22 = vld [vmem:[%s1858_s14 + $0x154] ss:$8 sps:$4 sm:$0xff]   ;;  %v1404_v24 = vld [vmem:[%s1858_s14 + $0x150] ss:$8 sps:$4 sm:$0xff]  }
  0x93   : > { %812 = vmatprep.subr.bf16.mxu1 %v1383_v10  ;;  %v1405_v25 = vld [vmem:[%s1858_s14 + $0x64] ss:$8 sps:$4 sm:$0xff]   ;;  %v1409_v27 = vld [vmem:[%s1858_s14 + $0x60] ss:$8 sps:$4 sm:$0xff]   ;;  %v1411_v29 = vld [vmem:[%s1858_s14 + $0x74] ss:$8 sps:$4 sm:$0xff]  }
  0x94   : > { %v1407_v26 = vld [vmem:[%s1858_s14 + $0x164] ss:$8 sps:$4 sm:$0xff]   ;;  %v1410_v28 = vld [vmem:[%s1858_s14 + $0x160] ss:$8 sps:$4 sm:$0xff]   ;;  %v1413_v30 = vld [vmem:[%s1858_s14 + $0x174] ss:$8 sps:$4 sm:$0xff]  }
  0x95   : > { %772 = vmatpush1.bf16.msra.mxu0 %v1385_v11  ;;  %v1415_v31 = vld [vmem:[%s1858_s14 + $0x70] ss:$8 sps:$4 sm:$0xff]   ;;  %v1417_v33 = vld [vmem:[%s1858_s14 + $0x84] ss:$8 sps:$4 sm:$0xff]   ;;  %v1421_v35 = vld [vmem:[%s1858_s14 + $0x80] ss:$8 sps:$4 sm:$0xff]  }
  0x96   : > { %813 = vmatpush1.bf16.msra.mxu1 %v1386_v12  ;;  %773 = vmatprep.subr.bf16.mxu0 %v1387_v13  ;;  %v1416_v32 = vld [vmem:[%s1858_s14 + $0x170] ss:$8 sps:$4 sm:$0xff]   ;;  %v1419_v34 = vld [vmem:[%s1858_s14 + $0x184] ss:$8 sps:$4 sm:$0xff]   ;;  %v1422_v36 = vld [vmem:[%s1858_s14 + $0x180] ss:$8 sps:$4 sm:$0xff]  }
  0x97   : > { %814 = vmatprep.subr.bf16.mxu1 %v1389_v14  ;;  %v1423_v37 = vld [vmem:[%s1858_s14 + $0x94] ss:$8 sps:$4 sm:$0xff]   ;;  %v1664_v39 = vmov 1983009808   ;;  %v1427_v42 = vld [vmem:[%s1858_s14 + $0x90] ss:$8 sps:$4 sm:$0xff]  }
  0x98   : > { %v1425_v38 = vld [vmem:[%s1858_s14 + $0x194] ss:$8 sps:$4 sm:$0xff]   ;;  %v344_v40 = vunpack.c.l.s4 %v1664_v39  ;;  %v1428_v43 = vld [vmem:[%s1858_s14 + $0x190] ss:$8 sps:$4 sm:$0xff]   ;;  %v1429_v44 = vld [vmem:[%s1858_s14 + $0xa4] ss:$8 sps:$4 sm:$0xff]  }
  0x99   : > { %774 = vmatpush1.bf16.msra.mxu0 %v1391_v15  ;;  %v1431_v45 = vld [vmem:[%s1858_s14 + $0x1a4] ss:$8 sps:$4 sm:$0xff]   ;;  %v1911_v47 = vshrl.u32 %v346_v41, 7  ;;  %v1433_v48 = vld [vmem:[%s1858_s14 + $0xa0] ss:$8 sps:$4 sm:$0xff]   ;;  %p1245_p2 = scmp.ne.s32.totalorder %s1643_s21, 1 }
  0x9a   : > { %815 = vmatpush1.bf16.msra.mxu1 %v1392_v16  ;;  %775 = vmatprep.subr.bf16.mxu0 %v1393_v17  ;;  %v345_v46 = vunpack.c.0.s8 %v344_v40  ;;  %v1434_v49 = vld [vmem:[%s1858_s14 + $0x1a0] ss:$8 sps:$4 sm:$0xff]   ;;  %v1435_v50 = vld [vmem:[%s1858_s14 + $0xb4] ss:$8 sps:$4 sm:$0xff]   ;;  %v1439_v52 = vld [vmem:[%s1858_s14 + $0xb0] ss:$8 sps:$4 sm:$0xff]  }
  0x9b   : > { %816 = vmatprep.subr.bf16.mxu1 %v1395_v18  ;;  %v1437_v51 = vld [vmem:[%s1858_s14 + $0x1b4] ss:$8 sps:$4 sm:$0xff]   ;;  %v1440_v53 = vld [vmem:[%s1858_s14 + $0x1b0] ss:$8 sps:$4 sm:$0xff]   ;;  %v1465_v55 = vld [vmem:[%s1851_s28] ss:$8 sps:$4 sm:$0xff]  }
  0x9c   : > { %v348_v54 = vsub.s32 %v345_v46, %v1911_v47  ;;  %v1467_v56 = vld [vmem:[%s1851_s28 + $0x10] ss:$8 sps:$4 sm:$0xff]   ;;  %v1469_v57 = vld [vmem:[%s1851_s28 + $0x4] ss:$8 sps:$4 sm:$0xff]   ;;  %v1470_v60 = vld [vmem:[%s1851_s28 + $0x14] ss:$8 sps:$4 sm:$0xff]  }
  0x9d   : > { %776 = vmatpush1.bf16.msra.mxu0 %v1397_v19  ;;  %v1441_v58 = vld [vmem:[%s1858_s14 + $0xc4] ss:$8 sps:$4 sm:$0xff]   ;;  %v1445_v1 = vld [vmem:[%s1858_s14 + $0xc0] ss:$8 sps:$4 sm:$0xff]   ;;  %v1447_v4 = vld [vmem:[%s1858_s14 + $0xd4] ss:$8 sps:$4 sm:$0xff]  }
  0x9e   : > { %817 = vmatpush1.bf16.msra.mxu1 %v1398_v20  ;;  %777 = vmatprep.subr.bf16.mxu0 %v1399_v21  ;;  %v1443_v59 = vld [vmem:[%s1858_s14 + $0x1c4] ss:$8 sps:$4 sm:$0xff]   ;;  %v349_v61 = vrot.slane %v1465_v55, %v348_v54  ;;  %v363_v62 = vrot.slane %v1467_v56, %v348_v54  ;;  %v356_v63 = vrot.slane %v1469_v57, %v348_v54  ;;  %v1446_v2 = vld [vmem:[%s1858_s14 + $0x1c0] ss:$8 sps:$4 sm:$0xff]   ;;  %v1449_v5 = vld [vmem:[%s1858_s14 + $0x1d4] ss:$8 sps:$4 sm:$0xff]  }
  0x9f   : > { %818 = vmatprep.subr.bf16.mxu1 %v1401_v22  ;;  %v370_v0 = vrot.slane %v1470_v60, %v348_v54  ;;  %v1451_v9 = vld [vmem:[%s1858_s14 + $0xd0] ss:$8 sps:$4 sm:$0xff]   ;;  %v1453_v11 = vld [vmem:[%s1858_s14 + $0xe4] ss:$8 sps:$4 sm:$0xff]   ;;  %v1457_v13 = vld [vmem:[%s1858_s14 + $0xe0] ss:$8 sps:$4 sm:$0xff]  }
  0xa0   : > { %v372_v3 = vcombine.high %v349_v61, %v363_v62  ;;  %v1452_v10 = vld [vmem:[%s1858_s14 + $0x1d0] ss:$8 sps:$4 sm:$0xff]   ;;  %v1455_v12 = vld [vmem:[%s1858_s14 + $0x1e4] ss:$8 sps:$4 sm:$0xff]   ;;  %v1458_v14 = vld [vmem:[%s1858_s14 + $0x1e0] ss:$8 sps:$4 sm:$0xff]   ;;  %v371_v17 = vcombine.low %v349_v61, %v363_v62 }
  0xa1   : > { %778 = vmatpush1.bf16.msra.mxu0 %v1403_v23  ;;  %v374_v6 = vcombine.high %v356_v63, %v370_v0  ;;  %v1459_v15 = vld [vmem:[%s1858_s14 + $0xf4] ss:$8 sps:$4 sm:$0xff]   ;;  %v373_v18 = vcombine.low %v356_v63, %v370_v0  ;;  %v1463_v19 = vld [vmem:[%s1858_s14 + $0xf0] ss:$8 sps:$4 sm:$0xff]   ;;  %v1473_v39 = vld [vmem:[#allocation8 + $0x48] sm:$0xff] (!%p1245_p2)   ;;  %v867_v46 = vsub.s32 (!%p1245_p2), 1, %v1911_v47 }
  0xa2   : > { %819 = vmatpush1.bf16.msra.mxu1 %v1404_v24  ;;  %779 = vmatprep.subr.bf16.mxu0 %v1405_v25  ;;  %v380_v7 = vpack.c.bf16 %v372_v3, %v372_v3  ;;  %v1461_v16 = vld [vmem:[%s1858_s14 + $0x1f4] ss:$8 sps:$4 sm:$0xff]   ;;  %v1464_v20 = vld [vmem:[%s1858_s14 + $0x1f0] ss:$8 sps:$4 sm:$0xff]   ;;  %v379_v21 = vpack.c.bf16 %v371_v17, %v371_v17  ;;  %v1474_v40 = vld [vmem:[#allocation8 + $0x8] sm:$0xff] (!%p1245_p2)  }
  0xa3   : > { %820 = vmatprep.subr.bf16.mxu1 %v1407_v26  ;;  %v382_v8 = vpack.c.bf16 %v374_v6, %v374_v6  ;;  %v381_v22 = vpack.c.bf16 %v373_v18, %v373_v18  ;;  %v329_v24 = vld [vmem:[#allocation2] sm:$0xff]  ;;  %v1482_v55 = vld [vmem:[#allocation8 + $0x28] sm:$0xff] (!%p1245_p2)   ;;  %v1485_v62 = vld [vmem:[#allocation8 + $0x78] sm:$0xff] (!%p1245_p2)  }
  0xa4   : > { %799 = vmatprep.mubr.bf16.mxu0 %v380_v7  ;;  %v1475_v41 = vld [vmem:[#allocation8 + $0x50] sm:$0xff] (!%p1245_p2)   ;;  %v1486_v0 = vld [vmem:[#allocation8 + $0x38] sm:$0xff] (!%p1245_p2)  }
  0xa5   : > { %780 = vmatpush1.bf16.msra.mxu0 %v1409_v27  ;;  %840 = vmatprep.mubr.bf16.mxu1 %v382_v8  ;;  %v1246_v3 = vld [vmem:[%s1985_s4] ss:$0 sm:$0xff] (!%p1245_p2) }
  0xa6   : > { %821 = vmatpush1.bf16.msra.mxu1 %v1410_v28  ;;  %781 = vmatprep.subr.bf16.mxu0 %v1411_v29  ;;  %v330_v28 = vld [vmem:[#allocation2 + $0x8] sm:$0xff] }
  0xa7   : > { %822 = vmatprep.subr.bf16.mxu1 %v1413_v30 }
  0xa9   : > { %782 = vmatpush1.bf16.msra.mxu0 %v1415_v31 }
  0xaa   : > { %823 = vmatpush1.bf16.msra.mxu1 %v1416_v32  ;;  %783 = vmatprep.subr.bf16.mxu0 %v1417_v33 }
  0xab   : > { %824 = vmatprep.subr.bf16.mxu1 %v1419_v34 }
  0xad   : > { %784 = vmatpush1.bf16.msra.mxu0 %v1421_v35 }
  0xae   : > { %825 = vmatpush1.bf16.msra.mxu1 %v1422_v36  ;;  %785 = vmatprep.subr.bf16.mxu0 %v1423_v37  ;;  %v1471_v37 = vld [vmem:[#allocation8 + $0x40] sm:$0xff] (!%p1245_p2)  }
  0xaf   : > { %826 = vmatprep.subr.bf16.mxu1 %v1425_v38  ;;  %v1472_v38 = vld [vmem:[#allocation8] sm:$0xff] (!%p1245_p2)  }
  0xb1   : > { %786 = vmatpush1.bf16.msra.mxu0 %v1427_v42  ;;  %v1476_v42 = vld [vmem:[#allocation8 + $0x10] sm:$0xff] (!%p1245_p2)  }
  0xb2   : > { %827 = vmatpush1.bf16.msra.mxu1 %v1428_v43  ;;  %787 = vmatprep.subr.bf16.mxu0 %v1429_v44  ;;  %v1477_v43 = vld [vmem:[#allocation8 + $0x58] sm:$0xff] (!%p1245_p2)  }
  0xb3   : > { %828 = vmatprep.subr.bf16.mxu1 %v1431_v45  ;;  %v1478_v44 = vld [vmem:[#allocation8 + $0x18] sm:$0xff] (!%p1245_p2)   ;;  %v1479_v45 = vld [vmem:[#allocation8 + $0x60] sm:$0xff] (!%p1245_p2)  }
  0xb5   : > { %788 = vmatpush1.bf16.msra.mxu0 %v1433_v48  ;;  %v863_v48 = vsub.s32 (!%p1245_p2), 0, %v1911_v47  ;;  %v1484_v47 = vld [vmem:[#allocation8 + $0x30] sm:$0xff] (!%p1245_p2)  }
  0xb6   : > { %829 = vmatpush1.bf16.msra.mxu1 %v1434_v49  ;;  %789 = vmatprep.subr.bf16.mxu0 %v1435_v50  ;;  %v1480_v49 = vld [vmem:[#allocation8 + $0x20] sm:$0xff] (!%p1245_p2)   ;;  %v1481_v50 = vld [vmem:[#allocation8 + $0x68] sm:$0xff] (!%p1245_p2)  }
  0xb7   : > { %830 = vmatprep.subr.bf16.mxu1 %v1437_v51 }
  0xb9   : > { %790 = vmatpush1.bf16.msra.mxu0 %v1439_v52  ;;  %v859_v52 = vld [vmem:[%s1983_s2] sm:$0x3] (!%p1245_p2) }
  0xba   : > { %831 = vmatpush1.bf16.msra.mxu1 %v1440_v53  ;;  %791 = vmatprep.subr.bf16.mxu0 %v1441_v58  ;;  %v868_v53 = vrot.slane (!%p1245_p2), %v859_v52, %v867_v46  ;;  %v864_v54 = vrot.slane (!%p1245_p2), %v859_v52, %v863_v48  ;;  %v1483_v58 = vld [vmem:[#allocation8 + $0x70] sm:$0xff] (!%p1245_p2)  }
  0xbb   : > { %832 = vmatprep.subr.bf16.mxu1 %v1443_v59 }
  0xbd   : > { %792 = vmatpush1.bf16.msra.mxu0 %v1445_v1 }
  0xbe   : > { %833 = vmatpush1.bf16.msra.mxu1 %v1446_v2  ;;  %793 = vmatprep.subr.bf16.mxu0 %v1447_v4 }
  0xbf   : > { %834 = vmatprep.subr.bf16.mxu1 %v1449_v5 }
  0xc1   : > { %794 = vmatpush1.bf16.msra.mxu0 %v1451_v9 }
  0xc2   : > { %835 = vmatpush1.bf16.msra.mxu1 %v1452_v10  ;;  %795 = vmatprep.subr.bf16.mxu0 %v1453_v11 }
  0xc3   : > { %836 = vmatprep.subr.bf16.mxu1 %v1455_v12 }
  0xc5   : > { %796 = vmatpush1.bf16.msra.mxu0 %v1457_v13 }
  0xc6   : > { %837 = vmatpush1.bf16.msra.mxu1 %v1458_v14  ;;  %797 = vmatprep.subr.bf16.mxu0 %v1459_v15 }
  0xc7   : > { %838 = vmatprep.subr.bf16.mxu1 %v1461_v16 }
  0xc9   : > { %798 = vmatpush1.bf16.msra.mxu0 %v1463_v19 }
  0xca   : > { %839 = vmatpush1.bf16.msra.mxu1 %v1464_v20  ;;  %1270 = vmatprep.subr.bf16.mxu0 (!%p1245_p2), %v1471_v37 }
  0xcc   : > { %800 = vmatmul.mubr.bf16.vlgmr.msra.gmra.mrb[0].mxu0 %v379_v21 }
  0xcd   : > { %841 = vmatmul.mubr.bf16.vlgmr.msra.gmra.mrb[0].mxu1 %v381_v22  ;;  %1271 = vmatpush3.bf16.msra.mxu0 (!%p1245_p2), %v1472_v38 }
  0xce   : > { %1272 = vmatprep.subr.bf16.mxu0 (!%p1245_p2), %v1473_v39 }
  0xd1   : > { %1273 = vmatpush3.bf16.msra.mxu0 (!%p1245_p2), %v1474_v40 }
  0xd2   : > { %1274 = vmatprep.subr.bf16.mxu0 (!%p1245_p2), %v1475_v41 }
  0xd5   : > { %1275 = vmatpush3.bf16.msra.mxu0 (!%p1245_p2), %v1476_v42 }
  0xd6   : > { %1276 = vmatprep.subr.bf16.mxu0 (!%p1245_p2), %v1477_v43 }
  0xd9   : > { %1277 = vmatpush3.bf16.msra.mxu0 (!%p1245_p2), %v1478_v44 }
  0xda   : > { %1278 = vmatprep.subr.bf16.mxu0 (!%p1245_p2), %v1479_v45 }
  0xdd   : > { %1279 = vmatpush3.bf16.msra.mxu0 (!%p1245_p2), %v1480_v49 }
  0xde   : > { %1280 = vmatprep.subr.bf16.mxu0 (!%p1245_p2), %v1481_v50 }
  0xe1   : > { %1281 = vmatpush3.bf16.msra.mxu0 (!%p1245_p2), %v1482_v55 }
  0xe2   : > { %1282 = vmatprep.subr.bf16.mxu0 (!%p1245_p2), %v1483_v58 }
  0xe5   : > { %1283 = vmatpush3.bf16.msra.mxu0 (!%p1245_p2), %v1484_v47 }
  0xe6   : > { %1284 = vmatprep.subr.bf16.mxu0 (!%p1245_p2), %v1485_v62 }
  0xe9   : > { %1285 = vmatpush3.bf16.msra.mxu0 (!%p1245_p2), %v1486_v0 }
 0x19f   : > { %v801_v23 = vpop.f32.mrb[0].mxu0 }
 0x1a0   : > { %v842_v25 = vpop.f32.mrb[0].mxu1  ;;  %v803_v27 = vpop.f32.mrb[1].mxu0  ;;  %856 = sbr.rel (%p1245_p2) target bundleno = 655 (0x28f), region = 60 }
 0x1a1   : > { %v843_v26 = vadd.f32 %v842_v25, %v801_v23  ;;  %v844_v29 = vpop.f32.mrb[1].mxu1  ;;  %v805_v31 = vpop.f32.mrb[2].mxu0 }
 0x1a2   : > { %v845_v30 = vadd.f32 %v844_v29, %v803_v27  ;;  %v846_v32 = vpop.f32.mrb[2].mxu1  ;;  %v806_v34 = vpop.f32.mrb[3].mxu0 }
 0x1a3   : > { %v849_v33 = vadd.f32 %v843_v26, %v329_v24  ;;  %v847_v35 = vpop.f32.mrb[3].mxu1 }
 0x1a4   : > { %v850_v36 = vadd.f32 %v845_v30, %v330_v28 }
 0x1a5   : > { %851 = vst [vmem:[#allocation2] sm:$0xff] %v849_v33 }
 0x1a6   : > { %852 = vst [vmem:[#allocation2 + $0x8] sm:$0xff] %v850_v36 }
 0x1ac   : > { %v857_v57 = vld [vmem:[#allocation2] sm:$0xff] }
 0x1ad   : > { %v858_v51 = vld [vmem:[#allocation2 + $0x8] sm:$0xff]  ;;  %v871_v60 = vadd.f32 %v864_v54, %v857_v57 }
 0x1ae   : > { %v872_v56 = vadd.f32 %v868_v53, %v858_v51 }
 0x1af   : > { %v873_v63 = vmax.f32 %v871_v60, 0.0 }
 0x1b0   : > { %v874_v59 = vmax.f32 %v872_v56, 0.0 }
 0x1b1   : > { %v875_v1 = vpack.c.bf16 %v873_v63, %v873_v63 }
 0x1b2   : > { %v876_v61 = vpack.c.bf16 %v874_v59, %v874_v59 }
 0x1b4   : > { %1044 = vmatprep.mubr.bf16.mxu0 %v876_v61 }
 0x1b5   : > { %1045 = vmatmul.mubr.bf16.vlgmr.msra.gmra.mrb[0].mxu0 %v875_v1 }
 0x288   : > { %v1286_v2 = vpop.f32.mrb[0].mxu0 }
 0x289   : > { %v1287_v4 = vpop.f32.mrb[1].mxu0 }
 0x28a   : > { %v1288_v5 = vadd.f32 %v1287_v4, %v1286_v2  ;;  %v1289_v6 = vpop.f32.mrb[2].mxu0 }
 0x28b   : > { %v1290_v7 = vpop.f32.mrb[3].mxu0 }
 0x28c   : > { %v1047_v8 = vadd.f32 %v1288_v5, %v1246_v3 }
 0x28e   : > { %1052 = vst [vmem:[#allocation9] sm:$0xff] %v1047_v8 }
 0x28f PF: > { %p1263_p4 = scmp.ne.s32.totalorder %s1727_s24, 1 }
 0x291   : > { %1055 = sbr.rel (%p1263_p4) target bundleno = 683 (0x2ab), region = 64 }
 0x298   : > { %1061 = vsyncadd [#allocation5], 96  ;;  %s1665_s26 = smov [#allocation9]  }
 0x299   : > { %s1066_s7 = sshll.u32 %s1665_s26, 4  ;;  %s1067_s7 = int_to_ptr.vmem [resolvable:$true] %s1066_s7 }
 0x29a   : > { %s1567_s11 = scalar_lea.vmem %s1067_s7, 32  ;;  %s1571_s13 = scalar_lea.vmem %s1067_s7, 128 }
 0x29b   : > { %p1568_p6 = scmp.ne.s32.totalorder %s1067_s7, %s1567_s11  ;;  %p1572_p7 = scmp.lt.s32.totalorder %s1067_s7, %s1067_s7 }
 0x29c   : > { %p1573_p9 = scmp.lt.s32.totalorder %s1571_s13, %s1567_s11 }
 0x29e   : > { %p1574_p11 = por %p1573_p9, %p1572_p7 }
 0x2a0   : > { %p1575_p13 = pnand %p1574_p11, %p1568_p6 }
 0x2a2   : > { %1578 = shalt.err (!%p1575_p13)
}
 0x2a3   : > { %s1579_s16 = scalar_lea.hbm %s1986_s5, 32 }
 0x2a4   : > { %p1580_p3 = scmp.ne.s32.totalorder %s1986_s5, %s1579_s16  ;;  %p1583_p8 = scmp.lt.u32.totalorder %s1579_s16, %s1986_s5 }
 0x2a6   : > { %p1585_p5 = pnand %p1583_p8, %p1580_p3 }
 0x2a8   : > { %1588 = shalt.err (!%p1585_p5)
}
 0x2a9   : > { %s1666_s9 = smov 32   ;;  %s1667_s12 = smov 2  }
 0x2aa   : > { %1072 = dma.vmem_to_hbm [thread:$0]  %s1067_s7, 32, %s1986_s5, [#allocation5], %s1666_s9, %s1666_s9, %s1667_s12  }
 0x2ab PF: > { %p1307_p10 = scmp.eq.s32.totalorder %s1727_s24, 1 }
 0x2ad   : > { %1626 = dma.done.wait (%p1307_p10), [#allocation5], 128  }
 0x2ae   : > { %1628 = vsyncadd (%p1307_p10), [#allocation5], 4294967168 }
 0x2af PF: > { %s22_s23 = sadd.s32 1, %s1651_s23   ;;  %s2001_s18 = smov %s1635_s19 }
 0x2b0   : > { %p19_p1 = scmp.ge.s32.totalorder %s22_s23, 4   ;;  %s2002_s19 = smov %s1639_s20 }
 0x2b1   : > { %s2003_s20 = smov %s1753_s30  ;;  %s2004_s21 = smov %s1647_s22 }
 0x2b2   : > { %s2005_s22 = smov %s2007_s25  ;;  %21 = sbr.rel (!%p19_p1) target bundleno = 7 (0x7), region = 103 }
 0x2b9   :  { %1082 = vsyncpa [#allocation4], 1 }
 0x2ba   :  { %1084 = vsyncpa [#allocation4 + $0x1], 1 }
 0x2bb   :  { %1085 = vsyncpa [#allocation7], 1 }
 0x2bc   :  { %1087 = vsyncpa [#allocation7 + $0x1], 1 }
 0x2bd   :  { %1088 = vsyncpa [#allocation5], 1 }
 0x2be   :  { %1090 = vsyncpa [#allocation5 + $0x1], 1 }

</bundles_post_ra>
